<compile_context>
chip_gen: v6e
topology: v6e:2x2x1
jax: 0.10.0
libtpu: 0.0.40
codegen_flags: <defaults>
</compile_context>

<pallas_src>
import functools

import jax
import jax.numpy as jnp
from jax import lax
from jax.experimental import pallas as pl
from jax.experimental.pallas import tpu as pltpu

_EPS_LOG = 1e-12
_LANES = 128


# ----------------------------------------------------------------------------
# helpers
# ----------------------------------------------------------------------------
def _l2norm(v):
    return v * lax.rsqrt(jnp.sum(v * v, axis=-1, keepdims=True) + 1e-12)


def _round_up(x, m):
    return -(-x // m) * m


def _choose_tile_b(B):
    # Sublane-aligned batch tile, capped at 64 so K*tile_b = 256 fills the MXU
    # rows on v6e/v7x while staying inside the smaller v7x VMEM budget.
    if B >= 64:
        return 64
    return max(8, _round_up(B, 8))


def _pad_batch(a, b_pad):
    b = a.shape[0]
    if b == b_pad:
        return a
    return jnp.pad(a, ((0, b_pad - b),) + ((0, 0),) * (a.ndim - 1))


def _const_spec(shape, grid_rank):
    """Grid-invariant (weight) block: constant index map, single-buffered."""
    if grid_rank == 1:
        index_map = lambda i: (0,) * len(shape)
    else:
        index_map = lambda i, p: (0,) * len(shape)
    try:
        return pl.BlockSpec(shape, index_map, pipeline_mode=pl.Buffered(1))
    except (TypeError, AttributeError):   # older jax without pipeline_mode
        return pl.BlockSpec(shape, index_map)


def _stats_row(pairs):
    """Lane-dense (1,1,128) f32 row with scalars at the given lanes."""
    lane = lax.broadcasted_iota(jnp.int32, (1, 1, _LANES), 2)
    row = jnp.zeros((1, 1, _LANES), jnp.float32)
    for idx, val in pairs:
        row = row + jnp.where(lane == idx, val, 0.0)
    return row


def _facet_stack(x, cates, K):
    """Per-facet gated, l2-normalized encoder rows stacked facet-major in bf16.
    The (K*tB, N) f32 intermediate is never materialized."""
    parts = []
    for k in range(K):
        xk = x * cates[k:k + 1, :]
        parts.append(_l2norm(xk).astype(jnp.bfloat16))
    return jnp.concatenate(parts, axis=0)          # (K*tB, N) bf16


# ----------------------------------------------------------------------------
# host-side (grid-invariant) parameter preparation
# ----------------------------------------------------------------------------
def _prep_gen_params(params, tau):
    items_n = _l2norm(params["items"].astype(jnp.float32))              # (N, D)
    cores_n = _l2norm(params["cores"].astype(jnp.float32))              # (K, D)
    cates = jax.nn.softmax(jnp.dot(cores_n, items_n.T) / tau, axis=0)   # (K, N)
    return (cates.astype(jnp.float32),
            items_n.astype(jnp.bfloat16),
            params["wmu"].astype(jnp.bfloat16),
            params["bmu"].astype(jnp.float32))


def _prep_disc_params(params, tau):
    items_n = _l2norm(params["items"].astype(jnp.float32))              # (N, D)
    cores_n = _l2norm(params["cores"].astype(jnp.float32))              # (K, D)
    cates = jax.nn.softmax(jnp.dot(cores_n, items_n.T) / tau, axis=0)   # (K, N)
    N, D = params["items"].shape
    Dp = _round_up(2 * D, _LANES)
    # fused encoder weight: lanes [0,D) -> mu, [D,2D) -> logvar, rest exact zero
    w_enc = jnp.zeros((N, Dp), jnp.float32)
    w_enc = w_enc.at[:, :D].set(params["wmu"]).at[:, D:2 * D].set(params["wlv"])
    b_enc = jnp.zeros((1, Dp), jnp.float32)
    b_enc = b_enc.at[:, :D].set(params["bmu"]).at[:, D:2 * D].set(params["blv"])
    items_pad = jnp.zeros((N, Dp), jnp.float32).at[:, :D].set(items_n)
    return (cates.astype(jnp.float32),
            items_pad.astype(jnp.bfloat16),
            w_enc.astype(jnp.bfloat16),
            b_enc.astype(jnp.float32),
            D)


# ----------------------------------------------------------------------------
# Kernel 1: generator forward + fused GumbelMax / aug_graph for both phases
# ----------------------------------------------------------------------------
def _gen_aug_kernel(x_ref, n1_ref, n2_ref, cates_ref, items_ref, wmu_ref,
                    bmu_ref, aug_ref, stats_ref, *, tau, tau_aug, K, batch):
    x = x_ref[...].astype(jnp.float32)                               # (tB, N)
    cates = cates_ref[...]                                           # (K, N) f32
    tb = x.shape[0]
    inv_tau = 1.0 / tau
    inv_ta = 1.0 / tau_aug
    dn_nt = (((1,), (1,)), ((), ()))                 # contract last dims, no .T

    # stacked-facet encoder (one matmul for all K facets), eval path z = mu
    x_stack_b = _facet_stack(x, cates, K)                            # (K*tB, N)
    mu = jnp.dot(x_stack_b, wmu_ref[...],
                 preferred_element_type=jnp.float32) + bmu_ref[...]  # (K*tB, D)
    z_n = _l2norm(mu)

    # decoder: exp(z.items^T / tau) mixed with cates (tau=0.1 keeps exp <= e^10)
    logits_stack = lax.dot_general(z_n.astype(jnp.bfloat16), items_ref[...],
                                   dn_nt,
                                   preferred_element_type=jnp.float32) * inv_tau
    el = jnp.exp(logits_stack)                                       # (K*tB, N)
    probs = jnp.zeros_like(x)
    for k in range(K):
        probs = probs + el[k * tb:(k + 1) * tb, :] * cates[k:k + 1, :]
    logits = jnp.log(probs + _EPS_LOG)                               # G output

    # GumbelMax (logistic noise precomputed on the host) + aug-graph fusion
    is0 = x == 0.0
    is1 = x == 1.0
    p1 = jax.nn.sigmoid((n1_ref[...].astype(jnp.float32) + logits) * inv_ta)
    aug1 = jnp.where(is0, 1.0 - (1.0 - x) * p1, jnp.where(is1, x * p1, 0.0))
    p2 = jax.nn.sigmoid((n2_ref[...].astype(jnp.float32) + logits) * inv_ta)
    aug2 = jnp.where(is0, 1.0 - (1.0 - x) * p2, jnp.where(is1, x * p2, 0.0))
    aug_ref[0] = aug1.astype(jnp.bfloat16)
    aug_ref[1] = aug2.astype(jnp.bfloat16)

    # per-tile stats, masked for batch-padding rows
    row_id = lax.broadcasted_iota(jnp.int32, (tb, 1), 0) + pl.program_id(0) * tb
    valid = (row_id < batch).astype(jnp.float32)                     # (tB, 1)
    f0 = is0.astype(jnp.float32) * valid
    f1 = is1.astype(jnp.float32) * valid
    add_num = jnp.sum(jnp.abs(aug1) * f0)          # ||aug[x==0]||_1 (phase 1)
    drop_num = jnp.sum(jnp.abs(1.0 - aug1) * f1)   # ||1-aug[x==1]||_1 (phase 1)
    stats_ref[...] = _stats_row([(0, add_num), (1, drop_num),
                                 (2, jnp.sum(f0)), (3, jnp.sum(f1))])


def gen_aug_forward(g_params, x_p, n1_p, n2_p, batch, *, tau, tau_aug, tile_b):
    b_pad, N = x_p.shape
    cates, items_n, wmu, bmu = _prep_gen_params(g_params, tau)
    K = cates.shape[0]
    D = items_n.shape[1]
    nb = b_pad // tile_b

    row = lambda i: (i, 0)
    kernel = functools.partial(_gen_aug_kernel, tau=tau, tau_aug=tau_aug,
                               K=K, batch=batch)
    aug_both, stats = pl.pallas_call(
        kernel,
        grid=(nb,),
        in_specs=[
            pl.BlockSpec((tile_b, N), row),        # x          (bf16)
            pl.BlockSpec((tile_b, N), row),        # noise 1    (bf16)
            pl.BlockSpec((tile_b, N), row),        # noise 2    (bf16)
            _const_spec((K, N), 1),                # cates      (f32, precomputed)
            _const_spec((N, D), 1),                # items_n    (bf16)
            _const_spec((N, D), 1),                # wmu        (bf16)
            _const_spec((1, D), 1),                # bmu        (f32)
        ],
        out_specs=(
            pl.BlockSpec((2, tile_b, N), lambda i: (0, i, 0)),    # aug 1 & 2
            pl.BlockSpec((1, 1, _LANES), lambda i: (i, 0, 0)),    # per-tile stats
        ),
        out_shape=(
            jax.ShapeDtypeStruct((2, b_pad, N), jnp.bfloat16),
            jax.ShapeDtypeStruct((nb, 1, _LANES), jnp.float32),
        ),
        compiler_params=pltpu.CompilerParams(
            dimension_semantics=("parallel",)),
    )(x_p, n1_p, n2_p, cates, items_n, wmu, bmu)
    return aug_both, stats


# ----------------------------------------------------------------------------
# Kernel 2: recommender (D) forward on both augmented graphs in one call
# ----------------------------------------------------------------------------
def _disc_kernel(aug_ref, xt_ref, cates_ref, items_ref, wenc_ref, benc_ref,
                 stats_ref, *, tau, K, D, batch):
    x_in = aug_ref[0].astype(jnp.float32)                            # (tB, N)
    x_tgt = xt_ref[...].astype(jnp.float32)                          # (tB, N)
    cates = cates_ref[...]                                           # (K, N) f32
    tb = x_in.shape[0]
    inv_tau = 1.0 / tau
    dn_nt = (((1,), (1,)), ((), ()))

    # one fused dense encoder matmul: lanes [0,D)=mu, [D,2D)=logvar
    x_stack_b = _facet_stack(x_in, cates, K)                         # (K*tB, N)
    enc = jnp.dot(x_stack_b, wenc_ref[...],
                  preferred_element_type=jnp.float32) + benc_ref[...]  # (K*tB, Dp)

    lane = lax.broadcasted_iota(jnp.int32, enc.shape, 1)
    is_mu = lane < D
    is_lv = jnp.logical_and(lane >= D, lane < 2 * D)

    row_id = lax.broadcasted_iota(jnp.int32, (tb, 1), 0) + pl.program_id(0) * tb
    valid = (row_id < batch).astype(jnp.float32)                     # (tB, 1)
    valid_stack = jnp.concatenate([valid] * K, axis=0)               # (K*tB, 1)

    # KL = sum 0.5*(-lv + exp(lv) + mu^2 - 1), split over mu / lv lanes
    kl_elem = jnp.where(is_mu, 0.5 * (enc * enc - 1.0),
                        jnp.where(is_lv, 0.5 * (jnp.exp(enc) - enc), 0.0))
    kl_sum = jnp.sum(kl_elem * valid_stack)

    mu_m = jnp.where(is_mu, enc, 0.0)                 # zero lv / pad lanes
    z_n = _l2norm(mu_m)                               # eval path: z = mu
    logits_stack = lax.dot_general(z_n.astype(jnp.bfloat16), items_ref[...],
                                   dn_nt,
                                   preferred_element_type=jnp.float32) * inv_tau
    el = jnp.exp(logits_stack)                                        # (K*tB, N)
    probs = jnp.zeros_like(x_in)
    for k in range(K):
        probs = probs + el[k * tb:(k + 1) * tb, :] * cates[k:k + 1, :]

    # log-softmax without a second exp/max pass (probs > 0)
    logits = jnp.log(probs + _EPS_LOG)
    lse = jnp.log(jnp.sum(probs, axis=-1, keepdims=True) + _EPS_LOG)
    recon_sum = jnp.sum(x_tgt * (lse - logits))       # = -sum(log_softmax * x)

    stats_ref[0] = _stats_row([(0, recon_sum), (1, kl_sum)])


def disc_forward(d_params, aug_both, x_p, batch, *, tau, tile_b):
    b_pad, N = x_p.shape
    cates, items_pad, w_enc, b_enc, D = _prep_disc_params(d_params, tau)
    K = cates.shape[0]
    Dp = items_pad.shape[1]
    nb = b_pad // tile_b

    kernel = functools.partial(_disc_kernel, tau=tau, K=K, D=D, batch=batch)
    stats = pl.pallas_call(
        kernel,
        grid=(nb, 2),              # phase innermost: x_tgt revisited, DMA'd once
        in_specs=[
            pl.BlockSpec((1, tile_b, N), lambda i, p: (p, i, 0)),   # aug (bf16)
            pl.BlockSpec((tile_b, N), lambda i, p: (i, 0)),         # x_tgt (bf16)
            _const_spec((K, N), 2),      # cates            (f32, precomputed)
            _const_spec((N, Dp), 2),     # items_n padded   (bf16)
            _const_spec((N, Dp), 2),     # fused [wmu|wlv]  (bf16)
            _const_spec((1, Dp), 2),     # fused [bmu|blv]  (f32)
        ],
        out_specs=pl.BlockSpec((1, 1, 1, _LANES), lambda i, p: (i, p, 0, 0)),
        out_shape=jax.ShapeDtypeStruct((nb, 2, 1, _LANES), jnp.float32),
        compiler_params=pltpu.CompilerParams(
            dimension_semantics=("parallel", "arbitrary")),
    )(aug_both, x_p, cates, items_pad, w_enc, b_enc)
    return stats


# ----------------------------------------------------------------------------
# ADV forward (forward-pass semantics of the PyTorch module)
# ----------------------------------------------------------------------------
def init_macrid_params(key, n_item, dfac, kfac):
    k1, k2, k3, k4 = jax.random.split(key, 4)
    s = 0.02
    return {
        "items": s * jax.random.normal(k1, (n_item, dfac), jnp.float32),
        "cores": s * jax.random.normal(k2, (kfac, dfac), jnp.float32),
        "wmu":   s * jax.random.normal(k3, (n_item, dfac), jnp.float32),
        "bmu":   jnp.zeros((1, dfac), jnp.float32),
        "wlv":   s * jax.random.normal(k4, (n_item, dfac), jnp.float32),
        "blv":   jnp.zeros((1, dfac), jnp.float32),
    }


def adv_forward(g_params, d_params, x, anneal, key, *, tau, tau_aug, rg_aug,
                is_train=False):
    del is_train  # TODO(synk): only the eval path (z = mu, no reparam noise) is implemented.
    B, N = x.shape
    tile_b = _choose_tile_b(B)
    b_pad = _round_up(B, tile_b)

    bias = 1e-4
    k1, k2 = jax.random.split(key)
    u1 = jax.random.uniform(k1, (B, N), jnp.float32)
    u2 = jax.random.uniform(k2, (B, N), jnp.float32)
    d1 = (bias - (1.0 - bias)) * u1 + (1.0 - bias)
    d2 = (bias - (1.0 - bias)) * u2 + (1.0 - bias)
    # logistic transform hoisted out of the kernel; bf16 halves its HBM traffic
    noise1 = (jnp.log(d1) - jnp.log(1.0 - d1)).astype(jnp.bfloat16)
    noise2 = (jnp.log(d2) - jnp.log(1.0 - d2)).astype(jnp.bfloat16)

    x_p = _pad_batch(x.astype(jnp.bfloat16), b_pad)   # x is {0,1}: exact in bf16
    n1_p = _pad_batch(noise1, b_pad)
    n2_p = _pad_batch(noise2, b_pad)

    # One generator forward for both phases (dedup) with fused GumbelMax.
    aug_both, g_stats = gen_aug_forward(g_params, x_p, n1_p, n2_p, B,
                                        tau=tau, tau_aug=tau_aug, tile_b=tile_b)
    add = jnp.sum(g_stats[:, 0, 0]) / jnp.maximum(jnp.sum(g_stats[:, 0, 2]), 1.0)
    drop = jnp.sum(g_stats[:, 0, 1]) / jnp.maximum(jnp.sum(g_stats[:, 0, 3]), 1.0)

    # One recommender call covering phase-1 and phase-2 augmented graphs.
    d_stats = disc_forward(d_params, aug_both, x_p, B, tau=tau, tile_b=tile_b)
    inv_b = 1.0 / float(B)
    recon1 = jnp.sum(d_stats[:, 0, 0, 0]) * inv_b     # phase-1 aug graph
    recon2 = jnp.sum(d_stats[:, 1, 0, 0]) * inv_b     # phase-2 aug graph
    kl2 = jnp.sum(d_stats[:, 1, 0, 1]) * inv_b

    reg_aug = add + drop
    aug_loss = -recon1 + rg_aug * reg_aug
    rec_loss = recon2 + anneal * kl2
    # TODO(synk): aug_loss.backward()/opt_aug.step() and rec_loss.backward()/opt.step()
    #             skipped (no forward-pass Pallas equivalent).

    mi_rec = jnp.zeros((1,), jnp.float32)   # matches torch.zeros(1) in the reference
    mi_aug = jnp.zeros((1,), jnp.float32)
    return (rec_loss, aug_loss, mi_rec, mi_aug, recon2, kl2, reg_aug, drop, add)


if __name__ == "__main__":
    B = 8         # batch of users
    N_ITEM = 256  # number of items (lanes)
    DFAC = 64     # latent dim per facet
    KFAC = 4      # number of facets (prototypes)

    TAU = 0.1
    TAU_AUG = 0.2
    RG_AUG = 1.0
    ANNEAL = 0.2

    root = jax.random.PRNGKey(0)
    kx, kg, kd, krun = jax.random.split(root, 4)

    x = (jax.random.uniform(kx, (B, N_ITEM)) < 0.1).astype(jnp.float32)
    g_params = init_macrid_params(kg, N_ITEM, DFAC, KFAC)
    d_params = init_macrid_params(kd, N_ITEM, DFAC, KFAC)

    fwd = jax.jit(functools.partial(adv_forward, tau=TAU, tau_aug=TAU_AUG,
                                    rg_aug=RG_AUG, is_train=False))
    outs = jax.block_until_ready(fwd(g_params, d_params, x, ANNEAL, krun))

    rec_loss, aug_loss, mi_rec, mi_aug, recon, kl, reg_aug, drop, add = outs
    assert bool(jnp.isfinite(rec_loss)) and bool(jnp.isfinite(aug_loss))
    assert bool(jnp.isfinite(reg_aug)) and bool(jnp.isfinite(kl))
    print("KERNEL_OK")
</pallas_src>

<mosaic_0001>
module attributes {stable_mosaic.version = 11 : i64} {
  func.func @_gen_aug_kernel(%arg0: i32, %arg1: memref<8x256xbf16, #tpu.memory_space<vmem>>, %arg2: memref<8x256xbf16, #tpu.memory_space<vmem>>, %arg3: memref<8x256xbf16, #tpu.memory_space<vmem>>, %arg4: memref<4x256xf32, #tpu.memory_space<vmem>>, %arg5: memref<256x64xbf16, #tpu.memory_space<vmem>>, %arg6: memref<256x64xbf16, #tpu.memory_space<vmem>>, %arg7: memref<1x64xf32, #tpu.memory_space<vmem>>, %arg8: memref<2x8x256xbf16, #tpu.memory_space<vmem>>, %arg9: memref<1x1x128xf32, #tpu.memory_space<vmem>>) attributes {dimension_semantics = [#tpu.dimension_semantics<parallel>], iteration_bounds = array<i64: 1>, scalar_prefetch = 0 : i64, scratch_operands = 0 : i64, tpu.core_type = #tpu.core_type<tc>, window_params = [{transform_indices = @transform_0, window_bounds = array<i64: 8, 256>}, {transform_indices = @transform_1, window_bounds = array<i64: 8, 256>}, {transform_indices = @transform_2, window_bounds = array<i64: 8, 256>}, {pipeline_mode = #tpu.pipeline_mode<synchronous>, transform_indices = @transform_3, window_bounds = array<i64: 4, 256>}, {pipeline_mode = #tpu.pipeline_mode<synchronous>, transform_indices = @transform_4, window_bounds = array<i64: 256, 64>}, {pipeline_mode = #tpu.pipeline_mode<synchronous>, transform_indices = @transform_5, window_bounds = array<i64: 256, 64>}, {pipeline_mode = #tpu.pipeline_mode<synchronous>, transform_indices = @transform_6, window_bounds = array<i64: 1, 64>}, {transform_indices = @transform_7, window_bounds = array<i64: 2, 8, 256>}, {transform_indices = @transform_8, window_bounds = array<i64: 1, 1, 128>}]} {
    %c0 = arith.constant 0 : index
    %c0_0 = arith.constant 0 : index
    %0 = vector.load %arg1[%c0, %c0_0] : memref<8x256xbf16, #tpu.memory_space<vmem>>, vector<8x256xbf16>
    %1 = arith.extf %0 : vector<8x256xbf16> to vector<8x256xf32>
    %c0_1 = arith.constant 0 : index
    %c0_2 = arith.constant 0 : index
    %2 = vector.load %arg4[%c0_1, %c0_2] : memref<4x256xf32, #tpu.memory_space<vmem>>, vector<4x256xf32>
    %3 = vector.extract_strided_slice %2 {offsets = [0, 0], sizes = [1, 256], strides = [1, 1]} : vector<4x256xf32> to vector<1x256xf32>
    %4 = vector.broadcast %3 : vector<1x256xf32> to vector<8x256xf32>
    %5 = arith.mulf %1, %4 : vector<8x256xf32>
    %6 = arith.mulf %5, %5 : vector<8x256xf32>
    %cst = arith.constant dense<0.000000e+00> : vector<8xf32>
    %7 = vector.multi_reduction <add>, %6, %cst [1] : vector<8x256xf32> to vector<8xf32>
    %8 = vector.shape_cast %7 : vector<8xf32> to vector<8x1xf32>
    %cst_3 = arith.constant 9.99999996E-13 : f32
    %9 = vector.broadcast %cst_3 : f32 to vector<8x1xf32>
    %10 = arith.addf %8, %9 : vector<8x1xf32>
    %11 = math.rsqrt %10 : vector<8x1xf32>
    %12 = vector.broadcast %11 : vector<8x1xf32> to vector<8x256xf32>
    %13 = arith.mulf %5, %12 : vector<8x256xf32>
    %14 = arith.truncf %13 : vector<8x256xf32> to vector<8x256xbf16>
    %15 = vector.extract_strided_slice %2 {offsets = [1, 0], sizes = [1, 256], strides = [1, 1]} : vector<4x256xf32> to vector<1x256xf32>
    %16 = vector.broadcast %15 : vector<1x256xf32> to vector<8x256xf32>
    %17 = arith.mulf %1, %16 : vector<8x256xf32>
    %18 = arith.mulf %17, %17 : vector<8x256xf32>
    %cst_4 = arith.constant dense<0.000000e+00> : vector<8xf32>
    %19 = vector.multi_reduction <add>, %18, %cst_4 [1] : vector<8x256xf32> to vector<8xf32>
    %20 = vector.shape_cast %19 : vector<8xf32> to vector<8x1xf32>
    %cst_5 = arith.constant 9.99999996E-13 : f32
    %21 = vector.broadcast %cst_5 : f32 to vector<8x1xf32>
    %22 = arith.addf %20, %21 : vector<8x1xf32>
    %23 = math.rsqrt %22 : vector<8x1xf32>
    %24 = vector.broadcast %23 : vector<8x1xf32> to vector<8x256xf32>
    %25 = arith.mulf %17, %24 : vector<8x256xf32>
    %26 = arith.truncf %25 : vector<8x256xf32> to vector<8x256xbf16>
    %27 = vector.extract_strided_slice %2 {offsets = [2, 0], sizes = [1, 256], strides = [1, 1]} : vector<4x256xf32> to vector<1x256xf32>
    %28 = vector.broadcast %27 : vector<1x256xf32> to vector<8x256xf32>
    %29 = arith.mulf %1, %28 : vector<8x256xf32>
    %30 = arith.mulf %29, %29 : vector<8x256xf32>
    %cst_6 = arith.constant dense<0.000000e+00> : vector<8xf32>
    %31 = vector.multi_reduction <add>, %30, %cst_6 [1] : vector<8x256xf32> to vector<8xf32>
    %32 = vector.shape_cast %31 : vector<8xf32> to vector<8x1xf32>
    %cst_7 = arith.constant 9.99999996E-13 : f32
    %33 = vector.broadcast %cst_7 : f32 to vector<8x1xf32>
    %34 = arith.addf %32, %33 : vector<8x1xf32>
    %35 = math.rsqrt %34 : vector<8x1xf32>
    %36 = vector.broadcast %35 : vector<8x1xf32> to vector<8x256xf32>
    %37 = arith.mulf %29, %36 : vector<8x256xf32>
    %38 = arith.truncf %37 : vector<8x256xf32> to vector<8x256xbf16>
    %39 = vector.extract_strided_slice %2 {offsets = [3, 0], sizes = [1, 256], strides = [1, 1]} : vector<4x256xf32> to vector<1x256xf32>
    %40 = vector.broadcast %39 : vector<1x256xf32> to vector<8x256xf32>
    %41 = arith.mulf %1, %40 : vector<8x256xf32>
    %42 = arith.mulf %41, %41 : vector<8x256xf32>
    %cst_8 = arith.constant dense<0.000000e+00> : vector<8xf32>
    %43 = vector.multi_reduction <add>, %42, %cst_8 [1] : vector<8x256xf32> to vector<8xf32>
    %44 = vector.shape_cast %43 : vector<8xf32> to vector<8x1xf32>
    %cst_9 = arith.constant 9.99999996E-13 : f32
    %45 = vector.broadcast %cst_9 : f32 to vector<8x1xf32>
    %46 = arith.addf %44, %45 : vector<8x1xf32>
    %47 = math.rsqrt %46 : vector<8x1xf32>
    %48 = vector.broadcast %47 : vector<8x1xf32> to vector<8x256xf32>
    %49 = arith.mulf %41, %48 : vector<8x256xf32>
    %50 = arith.truncf %49 : vector<8x256xf32> to vector<8x256xbf16>
    %51 = tpu.concatenate %14, %26, %38, %50 in 0 : vector<8x256xbf16>, vector<8x256xbf16>, vector<8x256xbf16>, vector<8x256xbf16> -> vector<32x256xbf16>
    %c0_10 = arith.constant 0 : index
    %c0_11 = arith.constant 0 : index
    %52 = vector.load %arg6[%c0_10, %c0_11] : memref<256x64xbf16, #tpu.memory_space<vmem>>, vector<256x64xbf16>
    %cst_12 = arith.constant dense<0.000000e+00> : vector<32x64xf32>
    %53 = tpu.matmul %51, %52, %cst_12 {dimension_numbers = #tpu.dot_dimension_numbers<[1], [0], [0], [1], [0, 0, 1, 1], [], []>} : vector<32x256xbf16>, vector<256x64xbf16>, vector<32x64xf32> -> vector<32x64xf32>
    %c0_13 = arith.constant 0 : index
    %c0_14 = arith.constant 0 : index
    %54 = vector.load %arg7[%c0_13, %c0_14] : memref<1x64xf32, #tpu.memory_space<vmem>>, vector<1x64xf32>
    %55 = vector.broadcast %54 : vector<1x64xf32> to vector<32x64xf32>
    %56 = arith.addf %53, %55 : vector<32x64xf32>
    %57 = arith.mulf %56, %56 : vector<32x64xf32>
    %cst_15 = arith.constant dense<0.000000e+00> : vector<32xf32>
    %58 = vector.multi_reduction <add>, %57, %cst_15 [1] : vector<32x64xf32> to vector<32xf32>
    %59 = vector.shape_cast %58 : vector<32xf32> to vector<32x1xf32>
    %cst_16 = arith.constant 9.99999996E-13 : f32
    %60 = vector.broadcast %cst_16 : f32 to vector<32x1xf32>
    %61 = arith.addf %59, %60 : vector<32x1xf32>
    %62 = math.rsqrt %61 : vector<32x1xf32>
    %63 = vector.broadcast %62 : vector<32x1xf32> to vector<32x64xf32>
    %64 = arith.mulf %56, %63 : vector<32x64xf32>
    %65 = arith.truncf %64 : vector<32x64xf32> to vector<32x64xbf16>
    %c0_17 = arith.constant 0 : index
    %c0_18 = arith.constant 0 : index
    %66 = vector.load %arg5[%c0_17, %c0_18] : memref<256x64xbf16, #tpu.memory_space<vmem>>, vector<256x64xbf16>
    %cst_19 = arith.constant dense<0.000000e+00> : vector<32x256xf32>
    %67 = tpu.matmul %65, %66, %cst_19 {dimension_numbers = #tpu.dot_dimension_numbers<[1], [1], [0], [0], [0, 0, 1, 0], [], []>} : vector<32x64xbf16>, vector<256x64xbf16>, vector<32x256xf32> -> vector<32x256xf32>
    %cst_20 = arith.constant 1.000000e+01 : f32
    %68 = vector.broadcast %cst_20 : f32 to vector<32x256xf32>
    %69 = arith.mulf %67, %68 : vector<32x256xf32>
    %70 = math.exp %69 : vector<32x256xf32>
    %cst_21 = arith.constant 0.000000e+00 : f32
    %71 = vector.broadcast %cst_21 : f32 to vector<8x256xf32>
    %72 = vector.extract_strided_slice %70 {offsets = [0, 0], sizes = [8, 256], strides = [1, 1]} : vector<32x256xf32> to vector<8x256xf32>
    %73 = vector.extract_strided_slice %2 {offsets = [0, 0], sizes = [1, 256], strides = [1, 1]} : vector<4x256xf32> to vector<1x256xf32>
    %74 = vector.broadcast %73 : vector<1x256xf32> to vector<8x256xf32>
    %75 = arith.mulf %72, %74 : vector<8x256xf32>
    %76 = arith.addf %71, %75 : vector<8x256xf32>
    %77 = vector.extract_strided_slice %70 {offsets = [8, 0], sizes = [8, 256], strides = [1, 1]} : vector<32x256xf32> to vector<8x256xf32>
    %78 = vector.extract_strided_slice %2 {offsets = [1, 0], sizes = [1, 256], strides = [1, 1]} : vector<4x256xf32> to vector<1x256xf32>
    %79 = vector.broadcast %78 : vector<1x256xf32> to vector<8x256xf32>
    %80 = arith.mulf %77, %79 : vector<8x256xf32>
    %81 = arith.addf %76, %80 : vector<8x256xf32>
    %82 = vector.extract_strided_slice %70 {offsets = [16, 0], sizes = [8, 256], strides = [1, 1]} : vector<32x256xf32> to vector<8x256xf32>
    %83 = vector.extract_strided_slice %2 {offsets = [2, 0], sizes = [1, 256], strides = [1, 1]} : vector<4x256xf32> to vector<1x256xf32>
    %84 = vector.broadcast %83 : vector<1x256xf32> to vector<8x256xf32>
    %85 = arith.mulf %82, %84 : vector<8x256xf32>
    %86 = arith.addf %81, %85 : vector<8x256xf32>
    %87 = vector.extract_strided_slice %70 {offsets = [24, 0], sizes = [8, 256], strides = [1, 1]} : vector<32x256xf32> to vector<8x256xf32>
    %88 = vector.extract_strided_slice %2 {offsets = [3, 0], sizes = [1, 256], strides = [1, 1]} : vector<4x256xf32> to vector<1x256xf32>
    %89 = vector.broadcast %88 : vector<1x256xf32> to vector<8x256xf32>
    %90 = arith.mulf %87, %89 : vector<8x256xf32>
    %91 = arith.addf %86, %90 : vector<8x256xf32>
    %cst_22 = arith.constant 9.99999996E-13 : f32
    %92 = vector.broadcast %cst_22 : f32 to vector<8x256xf32>
    %93 = arith.addf %91, %92 : vector<8x256xf32>
    %94 = math.log %93 : vector<8x256xf32>
    %cst_23 = arith.constant 0.000000e+00 : f32
    %95 = vector.broadcast %cst_23 : f32 to vector<8x256xf32>
    %96 = arith.cmpf oeq, %1, %95 : vector<8x256xf32>
    %cst_24 = arith.constant 1.000000e+00 : f32
    %97 = vector.broadcast %cst_24 : f32 to vector<8x256xf32>
    %98 = arith.cmpf oeq, %1, %97 : vector<8x256xf32>
    %c0_25 = arith.constant 0 : index
    %c0_26 = arith.constant 0 : index
    %99 = vector.load %arg2[%c0_25, %c0_26] : memref<8x256xbf16, #tpu.memory_space<vmem>>, vector<8x256xbf16>
    %100 = arith.extf %99 : vector<8x256xbf16> to vector<8x256xf32>
    %101 = arith.addf %100, %94 : vector<8x256xf32>
    %cst_27 = arith.constant 5.000000e+00 : f32
    %102 = vector.broadcast %cst_27 : f32 to vector<8x256xf32>
    %103 = arith.mulf %101, %102 : vector<8x256xf32>
    %104 = arith.negf %103 : vector<8x256xf32>
    %105 = math.exp %104 : vector<8x256xf32>
    %cst_28 = arith.constant 1.000000e+00 : f32
    %106 = vector.broadcast %cst_28 : f32 to vector<8x256xf32>
    %107 = arith.addf %106, %105 : vector<8x256xf32>
    %108 = arith.divf %106, %107 : vector<8x256xf32>
    %cst_29 = arith.constant 1.000000e+00 : f32
    %109 = vector.broadcast %cst_29 : f32 to vector<8x256xf32>
    %110 = arith.subf %109, %1 : vector<8x256xf32>
    %111 = arith.mulf %110, %108 : vector<8x256xf32>
    %cst_30 = arith.constant 1.000000e+00 : f32
    %112 = vector.broadcast %cst_30 : f32 to vector<8x256xf32>
    %113 = arith.subf %112, %111 : vector<8x256xf32>
    %114 = arith.mulf %1, %108 : vector<8x256xf32>
    %cst_31 = arith.constant 0.000000e+00 : f32
    %115 = vector.broadcast %cst_31 : f32 to vector<8x256xf32>
    %116 = arith.select %98, %114, %115 : vector<8x256xi1>, vector<8x256xf32>
    %117 = arith.select %96, %113, %116 : vector<8x256xi1>, vector<8x256xf32>
    %c0_32 = arith.constant 0 : index
    %c0_33 = arith.constant 0 : index
    %118 = vector.load %arg3[%c0_32, %c0_33] : memref<8x256xbf16, #tpu.memory_space<vmem>>, vector<8x256xbf16>
    %119 = arith.extf %118 : vector<8x256xbf16> to vector<8x256xf32>
    %120 = arith.addf %119, %94 : vector<8x256xf32>
    %cst_34 = arith.constant 5.000000e+00 : f32
    %121 = vector.broadcast %cst_34 : f32 to vector<8x256xf32>
    %122 = arith.mulf %120, %121 : vector<8x256xf32>
    %123 = arith.negf %122 : vector<8x256xf32>
    %124 = math.exp %123 : vector<8x256xf32>
    %cst_35 = arith.constant 1.000000e+00 : f32
    %125 = vector.broadcast %cst_35 : f32 to vector<8x256xf32>
    %126 = arith.addf %125, %124 : vector<8x256xf32>
    %127 = arith.divf %125, %126 : vector<8x256xf32>
    %cst_36 = arith.constant 1.000000e+00 : f32
    %128 = vector.broadcast %cst_36 : f32 to vector<8x256xf32>
    %129 = arith.subf %128, %1 : vector<8x256xf32>
    %130 = arith.mulf %129, %127 : vector<8x256xf32>
    %cst_37 = arith.constant 1.000000e+00 : f32
    %131 = vector.broadcast %cst_37 : f32 to vector<8x256xf32>
    %132 = arith.subf %131, %130 : vector<8x256xf32>
    %133 = arith.mulf %1, %127 : vector<8x256xf32>
    %cst_38 = arith.constant 0.000000e+00 : f32
    %134 = vector.broadcast %cst_38 : f32 to vector<8x256xf32>
    %135 = arith.select %98, %133, %134 : vector<8x256xi1>, vector<8x256xf32>
    %136 = arith.select %96, %132, %135 : vector<8x256xi1>, vector<8x256xf32>
    %137 = arith.truncf %117 : vector<8x256xf32> to vector<8x256xbf16>
    %c0_39 = arith.constant 0 : index
    %c0_40 = arith.constant 0 : index
    %c0_41 = arith.constant 0 : index
    %138 = vector.load %arg8[%c0_39, %c0_40, %c0_41] : memref<2x8x256xbf16, #tpu.memory_space<vmem>>, vector<1x8x256xbf16>
    %139 = vector.shape_cast %138 : vector<1x8x256xbf16> to vector<8x256xbf16>
    %140 = vector.shape_cast %137 : vector<8x256xbf16> to vector<1x8x256xbf16>
    tpu.vector_store %arg8[%c0_39, %c0_40, %c0_41], %140 {strides = array<i32>} : memref<2x8x256xbf16, #tpu.memory_space<vmem>>, vector<1x8x256xbf16>,
    %141 = arith.truncf %136 : vector<8x256xf32> to vector<8x256xbf16>
    %c1 = arith.constant 1 : index
    %c0_42 = arith.constant 0 : index
    %c0_43 = arith.constant 0 : index
    %142 = vector.load %arg8[%c1, %c0_42, %c0_43] : memref<2x8x256xbf16, #tpu.memory_space<vmem>>, vector<1x8x256xbf16>
    %143 = vector.shape_cast %142 : vector<1x8x256xbf16> to vector<8x256xbf16>
    %144 = vector.shape_cast %141 : vector<8x256xbf16> to vector<1x8x256xbf16>
    tpu.vector_store %arg8[%c1, %c0_42, %c0_43], %144 {strides = array<i32>} : memref<2x8x256xbf16, #tpu.memory_space<vmem>>, vector<1x8x256xbf16>,
    %145 = tpu.iota {dimensions = array<i32: 0>} : vector<8x1xi32>
    %c8_i32 = arith.constant 8 : i32
    %146 = arith.muli %arg0, %c8_i32 : i32
    %147 = vector.broadcast %146 : i32 to vector<8x1xi32>
    %148 = arith.addi %145, %147 : vector<8x1xi32>
    %c8_i32_44 = arith.constant 8 : i32
    %149 = vector.broadcast %c8_i32_44 : i32 to vector<8x1xi32>
    %150 = arith.cmpi slt, %148, %149 : vector<8x1xi32>
    %151 = arith.extui %150 : vector<8x1xi1> to vector<8x1xi32>
    %152 = arith.sitofp %151 : vector<8x1xi32> to vector<8x1xf32>
    %153 = arith.extui %96 : vector<8x256xi1> to vector<8x256xi32>
    %154 = arith.sitofp %153 : vector<8x256xi32> to vector<8x256xf32>
    %155 = vector.broadcast %152 : vector<8x1xf32> to vector<8x256xf32>
    %156 = arith.mulf %154, %155 : vector<8x256xf32>
    %157 = arith.extui %98 : vector<8x256xi1> to vector<8x256xi32>
    %158 = arith.sitofp %157 : vector<8x256xi32> to vector<8x256xf32>
    %159 = vector.broadcast %152 : vector<8x1xf32> to vector<8x256xf32>
    %160 = arith.mulf %158, %159 : vector<8x256xf32>
    %161 = math.absf %117 : vector<8x256xf32>
    %162 = arith.mulf %161, %156 : vector<8x256xf32>
    %163 = vector.shape_cast %162 : vector<8x256xf32> to vector<1x8x256xf32>
    %cst_45 = arith.constant dense<0.000000e+00> : vector<1xf32>
    %164 = vector.multi_reduction <add>, %163, %cst_45 [1, 2] : vector<1x8x256xf32> to vector<1xf32>
    %165 = vector.shape_cast %164 : vector<1xf32> to vector<1x1x1xf32>
    %166 = vector.extract %165[0, 0, 0] : f32 from vector<1x1x1xf32>
    %cst_46 = arith.constant 1.000000e+00 : f32
    %167 = vector.broadcast %cst_46 : f32 to vector<8x256xf32>
    %168 = arith.subf %167, %117 : vector<8x256xf32>
    %169 = math.absf %168 : vector<8x256xf32>
    %170 = arith.mulf %169, %160 : vector<8x256xf32>
    %171 = vector.shape_cast %170 : vector<8x256xf32> to vector<1x8x256xf32>
    %cst_47 = arith.constant dense<0.000000e+00> : vector<1xf32>
    %172 = vector.multi_reduction <add>, %171, %cst_47 [1, 2] : vector<1x8x256xf32> to vector<1xf32>
    %173 = vector.shape_cast %172 : vector<1xf32> to vector<1x1x1xf32>
    %174 = vector.extract %173[0, 0, 0] : f32 from vector<1x1x1xf32>
    %175 = vector.shape_cast %156 : vector<8x256xf32> to vector<1x8x256xf32>
    %cst_48 = arith.constant dense<0.000000e+00> : vector<1xf32>
    %176 = vector.multi_reduction <add>, %175, %cst_48 [1, 2] : vector<1x8x256xf32> to vector<1xf32>
    %177 = vector.shape_cast %176 : vector<1xf32> to vector<1x1x1xf32>
    %178 = vector.extract %177[0, 0, 0] : f32 from vector<1x1x1xf32>
    %179 = vector.shape_cast %160 : vector<8x256xf32> to vector<1x8x256xf32>
    %cst_49 = arith.constant dense<0.000000e+00> : vector<1xf32>
    %180 = vector.multi_reduction <add>, %179, %cst_49 [1, 2] : vector<1x8x256xf32> to vector<1xf32>
    %181 = vector.shape_cast %180 : vector<1xf32> to vector<1x1x1xf32>
    %182 = vector.extract %181[0, 0, 0] : f32 from vector<1x1x1xf32>
    %183 = tpu.iota {dimensions = array<i32: 2>} : vector<1x1x128xi32>
    %cst_50 = arith.constant 0.000000e+00 : f32
    %184 = vector.broadcast %cst_50 : f32 to vector<1x1x128xf32>
    %c0_i32 = arith.constant 0 : i32
    %185 = vector.broadcast %c0_i32 : i32 to vector<1x1x128xi32>
    %186 = arith.cmpi eq, %183, %185 : vector<1x1x128xi32>
    %cst_51 = arith.constant 0.000000e+00 : f32
    %187 = vector.broadcast %166 : f32 to vector<1x1x128xf32>
    %188 = vector.broadcast %cst_51 : f32 to vector<1x1x128xf32>
    %189 = arith.select %186, %187, %188 : vector<1x1x128xi1>, vector<1x1x128xf32>
    %190 = arith.addf %184, %189 : vector<1x1x128xf32>
    %c1_i32 = arith.constant 1 : i32
    %191 = vector.broadcast %c1_i32 : i32 to vector<1x1x128xi32>
    %192 = arith.cmpi eq, %183, %191 : vector<1x1x128xi32>
    %cst_52 = arith.constant 0.000000e+00 : f32
    %193 = vector.broadcast %174 : f32 to vector<1x1x128xf32>
    %194 = vector.broadcast %cst_52 : f32 to vector<1x1x128xf32>
    %195 = arith.select %192, %193, %194 : vector<1x1x128xi1>, vector<1x1x128xf32>
    %196 = arith.addf %190, %195 : vector<1x1x128xf32>
    %c2_i32 = arith.constant 2 : i32
    %197 = vector.broadcast %c2_i32 : i32 to vector<1x1x128xi32>
    %198 = arith.cmpi eq, %183, %197 : vector<1x1x128xi32>
    %cst_53 = arith.constant 0.000000e+00 : f32
    %199 = vector.broadcast %178 : f32 to vector<1x1x128xf32>
    %200 = vector.broadcast %cst_53 : f32 to vector<1x1x128xf32>
    %201 = arith.select %198, %199, %200 : vector<1x1x128xi1>, vector<1x1x128xf32>
    %202 = arith.addf %196, %201 : vector<1x1x128xf32>
    %c3_i32 = arith.constant 3 : i32
    %203 = vector.broadcast %c3_i32 : i32 to vector<1x1x128xi32>
    %204 = arith.cmpi eq, %183, %203 : vector<1x1x128xi32>
    %cst_54 = arith.constant 0.000000e+00 : f32
    %205 = vector.broadcast %182 : f32 to vector<1x1x128xf32>
    %206 = vector.broadcast %cst_54 : f32 to vector<1x1x128xf32>
    %207 = arith.select %204, %205, %206 : vector<1x1x128xi1>, vector<1x1x128xf32>
    %208 = arith.addf %202, %207 : vector<1x1x128xf32>
    %c0_55 = arith.constant 0 : index
    %c0_56 = arith.constant 0 : index
    %c0_57 = arith.constant 0 : index
    %209 = vector.load %arg9[%c0_55, %c0_56, %c0_57] : memref<1x1x128xf32, #tpu.memory_space<vmem>>, vector<1x1x128xf32>
    tpu.vector_store %arg9[%c0_55, %c0_56, %c0_57], %208 {strides = array<i32>} : memref<1x1x128xf32, #tpu.memory_space<vmem>>, vector<1x1x128xf32>,
    return
  }
  func.func @transform_0(%arg0: i32) -> (i32, i32) {
    %c0_i32 = arith.constant 0 : i32
    %c0_i32_0 = arith.constant 0 : i32
    return %arg0, %c0_i32 : i32, i32
  }
  func.func @transform_1(%arg0: i32) -> (i32, i32) {
    %c0_i32 = arith.constant 0 : i32
    %c0_i32_0 = arith.constant 0 : i32
    return %arg0, %c0_i32 : i32, i32
  }
  func.func @transform_2(%arg0: i32) -> (i32, i32) {
    %c0_i32 = arith.constant 0 : i32
    %c0_i32_0 = arith.constant 0 : i32
    return %arg0, %c0_i32 : i32, i32
  }
  func.func @transform_3(%arg0: i32) -> (i32, i32) {
    %c0_i32 = arith.constant 0 : i32
    %c0_i32_0 = arith.constant 0 : i32
    %c0_i32_1 = arith.constant 0 : i32
    return %c0_i32, %c0_i32_0 : i32, i32
  }
  func.func @transform_4(%arg0: i32) -> (i32, i32) {
    %c0_i32 = arith.constant 0 : i32
    %c0_i32_0 = arith.constant 0 : i32
    %c0_i32_1 = arith.constant 0 : i32
    return %c0_i32, %c0_i32_0 : i32, i32
  }
  func.func @transform_5(%arg0: i32) -> (i32, i32) {
    %c0_i32 = arith.constant 0 : i32
    %c0_i32_0 = arith.constant 0 : i32
    %c0_i32_1 = arith.constant 0 : i32
    return %c0_i32, %c0_i32_0 : i32, i32
  }
  func.func @transform_6(%arg0: i32) -> (i32, i32) {
    %c0_i32 = arith.constant 0 : i32
    %c0_i32_0 = arith.constant 0 : i32
    %c0_i32_1 = arith.constant 0 : i32
    return %c0_i32, %c0_i32_0 : i32, i32
  }
  func.func @transform_7(%arg0: i32) -> (i32, i32, i32) {
    %c0_i32 = arith.constant 0 : i32
    %c0_i32_0 = arith.constant 0 : i32
    %c0_i32_1 = arith.constant 0 : i32
    return %c0_i32, %arg0, %c0_i32_0 : i32, i32, i32
  }
  func.func @transform_8(%arg0: i32) -> (i32, i32, i32) {
    %c0_i32 = arith.constant 0 : i32
    %c0_i32_0 = arith.constant 0 : i32
    %c0_i32_1 = arith.constant 0 : i32
    return %arg0, %c0_i32, %c0_i32_0 : i32, i32, i32
  }
}

module attributes {stable_mosaic.version = 11 : i64} {
  func.func @_disc_kernel(%arg0: i32, %arg1: i32, %arg2: memref<1x8x256xbf16, #tpu.memory_space<vmem>>, %arg3: memref<8x256xbf16, #tpu.memory_space<vmem>>, %arg4: memref<4x256xf32, #tpu.memory_space<vmem>>, %arg5: memref<256x128xbf16, #tpu.memory_space<vmem>>, %arg6: memref<256x128xbf16, #tpu.memory_space<vmem>>, %arg7: memref<1x128xf32, #tpu.memory_space<vmem>>, %arg8: memref<1x1x1x128xf32, #tpu.memory_space<vmem>>) attributes {dimension_semantics = [#tpu.dimension_semantics<parallel>, #tpu.dimension_semantics<arbitrary>], iteration_bounds = array<i64: 1, 2>, scalar_prefetch = 0 : i64, scratch_operands = 0 : i64, tpu.core_type = #tpu.core_type<tc>, window_params = [{transform_indices = @transform_0, window_bounds = array<i64: 1, 8, 256>}, {transform_indices = @transform_1, window_bounds = array<i64: 8, 256>}, {pipeline_mode = #tpu.pipeline_mode<synchronous>, transform_indices = @transform_2, window_bounds = array<i64: 4, 256>}, {pipeline_mode = #tpu.pipeline_mode<synchronous>, transform_indices = @transform_3, window_bounds = array<i64: 256, 128>}, {pipeline_mode = #tpu.pipeline_mode<synchronous>, transform_indices = @transform_4, window_bounds = array<i64: 256, 128>}, {pipeline_mode = #tpu.pipeline_mode<synchronous>, transform_indices = @transform_5, window_bounds = array<i64: 1, 128>}, {transform_indices = @transform_6, window_bounds = array<i64: 1, 1, 1, 128>}]} {
    %c0 = arith.constant 0 : index
    %c0_0 = arith.constant 0 : index
    %c0_1 = arith.constant 0 : index
    %0 = vector.load %arg2[%c0, %c0_0, %c0_1] : memref<1x8x256xbf16, #tpu.memory_space<vmem>>, vector<1x8x256xbf16>
    %1 = vector.shape_cast %0 : vector<1x8x256xbf16> to vector<8x256xbf16>
    %2 = arith.extf %1 : vector<8x256xbf16> to vector<8x256xf32>
    %c0_2 = arith.constant 0 : index
    %c0_3 = arith.constant 0 : index
    %3 = vector.load %arg3[%c0_2, %c0_3] : memref<8x256xbf16, #tpu.memory_space<vmem>>, vector<8x256xbf16>
    %4 = arith.extf %3 : vector<8x256xbf16> to vector<8x256xf32>
    %c0_4 = arith.constant 0 : index
    %c0_5 = arith.constant 0 : index
    %5 = vector.load %arg4[%c0_4, %c0_5] : memref<4x256xf32, #tpu.memory_space<vmem>>, vector<4x256xf32>
    %6 = vector.extract_strided_slice %5 {offsets = [0, 0], sizes = [1, 256], strides = [1, 1]} : vector<4x256xf32> to vector<1x256xf32>
    %7 = vector.broadcast %6 : vector<1x256xf32> to vector<8x256xf32>
    %8 = arith.mulf %2, %7 : vector<8x256xf32>
    %9 = arith.mulf %8, %8 : vector<8x256xf32>
    %cst = arith.constant dense<0.000000e+00> : vector<8xf32>
    %10 = vector.multi_reduction <add>, %9, %cst [1] : vector<8x256xf32> to vector<8xf32>
    %11 = vector.shape_cast %10 : vector<8xf32> to vector<8x1xf32>
    %cst_6 = arith.constant 9.99999996E-13 : f32
    %12 = vector.broadcast %cst_6 : f32 to vector<8x1xf32>
    %13 = arith.addf %11, %12 : vector<8x1xf32>
    %14 = math.rsqrt %13 : vector<8x1xf32>
    %15 = vector.broadcast %14 : vector<8x1xf32> to vector<8x256xf32>
    %16 = arith.mulf %8, %15 : vector<8x256xf32>
    %17 = arith.truncf %16 : vector<8x256xf32> to vector<8x256xbf16>
    %18 = vector.extract_strided_slice %5 {offsets = [1, 0], sizes = [1, 256], strides = [1, 1]} : vector<4x256xf32> to vector<1x256xf32>
    %19 = vector.broadcast %18 : vector<1x256xf32> to vector<8x256xf32>
    %20 = arith.mulf %2, %19 : vector<8x256xf32>
    %21 = arith.mulf %20, %20 : vector<8x256xf32>
    %cst_7 = arith.constant dense<0.000000e+00> : vector<8xf32>
    %22 = vector.multi_reduction <add>, %21, %cst_7 [1] : vector<8x256xf32> to vector<8xf32>
    %23 = vector.shape_cast %22 : vector<8xf32> to vector<8x1xf32>
    %cst_8 = arith.constant 9.99999996E-13 : f32
    %24 = vector.broadcast %cst_8 : f32 to vector<8x1xf32>
    %25 = arith.addf %23, %24 : vector<8x1xf32>
    %26 = math.rsqrt %25 : vector<8x1xf32>
    %27 = vector.broadcast %26 : vector<8x1xf32> to vector<8x256xf32>
    %28 = arith.mulf %20, %27 : vector<8x256xf32>
    %29 = arith.truncf %28 : vector<8x256xf32> to vector<8x256xbf16>
    %30 = vector.extract_strided_slice %5 {offsets = [2, 0], sizes = [1, 256], strides = [1, 1]} : vector<4x256xf32> to vector<1x256xf32>
    %31 = vector.broadcast %30 : vector<1x256xf32> to vector<8x256xf32>
    %32 = arith.mulf %2, %31 : vector<8x256xf32>
    %33 = arith.mulf %32, %32 : vector<8x256xf32>
    %cst_9 = arith.constant dense<0.000000e+00> : vector<8xf32>
    %34 = vector.multi_reduction <add>, %33, %cst_9 [1] : vector<8x256xf32> to vector<8xf32>
    %35 = vector.shape_cast %34 : vector<8xf32> to vector<8x1xf32>
    %cst_10 = arith.constant 9.99999996E-13 : f32
    %36 = vector.broadcast %cst_10 : f32 to vector<8x1xf32>
    %37 = arith.addf %35, %36 : vector<8x1xf32>
    %38 = math.rsqrt %37 : vector<8x1xf32>
    %39 = vector.broadcast %38 : vector<8x1xf32> to vector<8x256xf32>
    %40 = arith.mulf %32, %39 : vector<8x256xf32>
    %41 = arith.truncf %40 : vector<8x256xf32> to vector<8x256xbf16>
    %42 = vector.extract_strided_slice %5 {offsets = [3, 0], sizes = [1, 256], strides = [1, 1]} : vector<4x256xf32> to vector<1x256xf32>
    %43 = vector.broadcast %42 : vector<1x256xf32> to vector<8x256xf32>
    %44 = arith.mulf %2, %43 : vector<8x256xf32>
    %45 = arith.mulf %44, %44 : vector<8x256xf32>
    %cst_11 = arith.constant dense<0.000000e+00> : vector<8xf32>
    %46 = vector.multi_reduction <add>, %45, %cst_11 [1] : vector<8x256xf32> to vector<8xf32>
    %47 = vector.shape_cast %46 : vector<8xf32> to vector<8x1xf32>
    %cst_12 = arith.constant 9.99999996E-13 : f32
    %48 = vector.broadcast %cst_12 : f32 to vector<8x1xf32>
    %49 = arith.addf %47, %48 : vector<8x1xf32>
    %50 = math.rsqrt %49 : vector<8x1xf32>
    %51 = vector.broadcast %50 : vector<8x1xf32> to vector<8x256xf32>
    %52 = arith.mulf %44, %51 : vector<8x256xf32>
    %53 = arith.truncf %52 : vector<8x256xf32> to vector<8x256xbf16>
    %54 = tpu.concatenate %17, %29, %41, %53 in 0 : vector<8x256xbf16>, vector<8x256xbf16>, vector<8x256xbf16>, vector<8x256xbf16> -> vector<32x256xbf16>
    %c0_13 = arith.constant 0 : index
    %c0_14 = arith.constant 0 : index
    %55 = vector.load %arg6[%c0_13, %c0_14] : memref<256x128xbf16, #tpu.memory_space<vmem>>, vector<256x128xbf16>
    %cst_15 = arith.constant dense<0.000000e+00> : vector<32x128xf32>
    %56 = tpu.matmul %54, %55, %cst_15 {dimension_numbers = #tpu.dot_dimension_numbers<[1], [0], [0], [1], [0, 0, 1, 1], [], []>} : vector<32x256xbf16>, vector<256x128xbf16>, vector<32x128xf32> -> vector<32x128xf32>
    %c0_16 = arith.constant 0 : index
    %c0_17 = arith.constant 0 : index
    %57 = vector.load %arg7[%c0_16, %c0_17] : memref<1x128xf32, #tpu.memory_space<vmem>>, vector<1x128xf32>
    %58 = vector.broadcast %57 : vector<1x128xf32> to vector<32x128xf32>
    %59 = arith.addf %56, %58 : vector<32x128xf32>
    %60 = tpu.iota {dimensions = array<i32: 1>} : vector<32x128xi32>
    %c64_i32 = arith.constant 64 : i32
    %61 = vector.broadcast %c64_i32 : i32 to vector<32x128xi32>
    %62 = arith.cmpi slt, %60, %61 : vector<32x128xi32>
    %c64_i32_18 = arith.constant 64 : i32
    %63 = vector.broadcast %c64_i32_18 : i32 to vector<32x128xi32>
    %64 = arith.cmpi sge, %60, %63 : vector<32x128xi32>
    %c128_i32 = arith.constant 128 : i32
    %65 = vector.broadcast %c128_i32 : i32 to vector<32x128xi32>
    %66 = arith.cmpi slt, %60, %65 : vector<32x128xi32>
    %67 = arith.andi %64, %66 : vector<32x128xi1>
    %68 = tpu.iota {dimensions = array<i32: 0>} : vector<8x1xi32>
    %c8_i32 = arith.constant 8 : i32
    %69 = arith.muli %arg0, %c8_i32 : i32
    %70 = vector.broadcast %69 : i32 to vector<8x1xi32>
    %71 = arith.addi %68, %70 : vector<8x1xi32>
    %c8_i32_19 = arith.constant 8 : i32
    %72 = vector.broadcast %c8_i32_19 : i32 to vector<8x1xi32>
    %73 = arith.cmpi slt, %71, %72 : vector<8x1xi32>
    %74 = arith.extui %73 : vector<8x1xi1> to vector<8x1xi32>
    %75 = arith.sitofp %74 : vector<8x1xi32> to vector<8x1xf32>
    %76 = tpu.concatenate %75, %75, %75, %75 in 0 : vector<8x1xf32>, vector<8x1xf32>, vector<8x1xf32>, vector<8x1xf32> -> vector<32x1xf32>
    %77 = arith.mulf %59, %59 : vector<32x128xf32>
    %cst_20 = arith.constant 1.000000e+00 : f32
    %78 = vector.broadcast %cst_20 : f32 to vector<32x128xf32>
    %79 = arith.subf %77, %78 : vector<32x128xf32>
    %cst_21 = arith.constant 5.000000e-01 : f32
    %80 = vector.broadcast %cst_21 : f32 to vector<32x128xf32>
    %81 = arith.mulf %80, %79 : vector<32x128xf32>
    %82 = math.exp %59 : vector<32x128xf32>
    %83 = arith.subf %82, %59 : vector<32x128xf32>
    %cst_22 = arith.constant 5.000000e-01 : f32
    %84 = vector.broadcast %cst_22 : f32 to vector<32x128xf32>
    %85 = arith.mulf %84, %83 : vector<32x128xf32>
    %cst_23 = arith.constant 0.000000e+00 : f32
    %86 = vector.broadcast %cst_23 : f32 to vector<32x128xf32>
    %87 = arith.select %67, %85, %86 : vector<32x128xi1>, vector<32x128xf32>
    %88 = arith.select %62, %81, %87 : vector<32x128xi1>, vector<32x128xf32>
    %89 = vector.broadcast %76 : vector<32x1xf32> to vector<32x128xf32>
    %90 = arith.mulf %88, %89 : vector<32x128xf32>
    %91 = vector.shape_cast %90 : vector<32x128xf32> to vector<1x32x128xf32>
    %cst_24 = arith.constant dense<0.000000e+00> : vector<1xf32>
    %92 = vector.multi_reduction <add>, %91, %cst_24 [1, 2] : vector<1x32x128xf32> to vector<1xf32>
    %93 = vector.shape_cast %92 : vector<1xf32> to vector<1x1x1xf32>
    %94 = vector.extract %93[0, 0, 0] : f32 from vector<1x1x1xf32>
    %cst_25 = arith.constant 0.000000e+00 : f32
    %95 = vector.broadcast %cst_25 : f32 to vector<32x128xf32>
    %96 = arith.select %62, %59, %95 : vector<32x128xi1>, vector<32x128xf32>
    %97 = arith.mulf %96, %96 : vector<32x128xf32>
    %cst_26 = arith.constant dense<0.000000e+00> : vector<32xf32>
    %98 = vector.multi_reduction <add>, %97, %cst_26 [1] : vector<32x128xf32> to vector<32xf32>
    %99 = vector.shape_cast %98 : vector<32xf32> to vector<32x1xf32>
    %cst_27 = arith.constant 9.99999996E-13 : f32
    %100 = vector.broadcast %cst_27 : f32 to vector<32x1xf32>
    %101 = arith.addf %99, %100 : vector<32x1xf32>
    %102 = math.rsqrt %101 : vector<32x1xf32>
    %103 = vector.broadcast %102 : vector<32x1xf32> to vector<32x128xf32>
    %104 = arith.mulf %96, %103 : vector<32x128xf32>
    %105 = arith.truncf %104 : vector<32x128xf32> to vector<32x128xbf16>
    %c0_28 = arith.constant 0 : index
    %c0_29 = arith.constant 0 : index
    %106 = vector.load %arg5[%c0_28, %c0_29] : memref<256x128xbf16, #tpu.memory_space<vmem>>, vector<256x128xbf16>
    %cst_30 = arith.constant dense<0.000000e+00> : vector<32x256xf32>
    %107 = tpu.matmul %105, %106, %cst_30 {dimension_numbers = #tpu.dot_dimension_numbers<[1], [1], [0], [0], [0, 0, 1, 0], [], []>} : vector<32x128xbf16>, vector<256x128xbf16>, vector<32x256xf32> -> vector<32x256xf32>
    %cst_31 = arith.constant 1.000000e+01 : f32
    %108 = vector.broadcast %cst_31 : f32 to vector<32x256xf32>
    %109 = arith.mulf %107, %108 : vector<32x256xf32>
    %110 = math.exp %109 : vector<32x256xf32>
    %cst_32 = arith.constant 0.000000e+00 : f32
    %111 = vector.broadcast %cst_32 : f32 to vector<8x256xf32>
    %112 = vector.extract_strided_slice %110 {offsets = [0, 0], sizes = [8, 256], strides = [1, 1]} : vector<32x256xf32> to vector<8x256xf32>
    %113 = vector.extract_strided_slice %5 {offsets = [0, 0], sizes = [1, 256], strides = [1, 1]} : vector<4x256xf32> to vector<1x256xf32>
    %114 = vector.broadcast %113 : vector<1x256xf32> to vector<8x256xf32>
    %115 = arith.mulf %112, %114 : vector<8x256xf32>
    %116 = arith.addf %111, %115 : vector<8x256xf32>
    %117 = vector.extract_strided_slice %110 {offsets = [8, 0], sizes = [8, 256], strides = [1, 1]} : vector<32x256xf32> to vector<8x256xf32>
    %118 = vector.extract_strided_slice %5 {offsets = [1, 0], sizes = [1, 256], strides = [1, 1]} : vector<4x256xf32> to vector<1x256xf32>
    %119 = vector.broadcast %118 : vector<1x256xf32> to vector<8x256xf32>
    %120 = arith.mulf %117, %119 : vector<8x256xf32>
    %121 = arith.addf %116, %120 : vector<8x256xf32>
    %122 = vector.extract_strided_slice %110 {offsets = [16, 0], sizes = [8, 256], strides = [1, 1]} : vector<32x256xf32> to vector<8x256xf32>
    %123 = vector.extract_strided_slice %5 {offsets = [2, 0], sizes = [1, 256], strides = [1, 1]} : vector<4x256xf32> to vector<1x256xf32>
    %124 = vector.broadcast %123 : vector<1x256xf32> to vector<8x256xf32>
    %125 = arith.mulf %122, %124 : vector<8x256xf32>
    %126 = arith.addf %121, %125 : vector<8x256xf32>
    %127 = vector.extract_strided_slice %110 {offsets = [24, 0], sizes = [8, 256], strides = [1, 1]} : vector<32x256xf32> to vector<8x256xf32>
    %128 = vector.extract_strided_slice %5 {offsets = [3, 0], sizes = [1, 256], strides = [1, 1]} : vector<4x256xf32> to vector<1x256xf32>
    %129 = vector.broadcast %128 : vector<1x256xf32> to vector<8x256xf32>
    %130 = arith.mulf %127, %129 : vector<8x256xf32>
    %131 = arith.addf %126, %130 : vector<8x256xf32>
    %cst_33 = arith.constant 9.99999996E-13 : f32
    %132 = vector.broadcast %cst_33 : f32 to vector<8x256xf32>
    %133 = arith.addf %131, %132 : vector<8x256xf32>
    %134 = math.log %133 : vector<8x256xf32>
    %cst_34 = arith.constant dense<0.000000e+00> : vector<8xf32>
    %135 = vector.multi_reduction <add>, %131, %cst_34 [1] : vector<8x256xf32> to vector<8xf32>
    %136 = vector.shape_cast %135 : vector<8xf32> to vector<8x1xf32>
    %cst_35 = arith.constant 9.99999996E-13 : f32
    %137 = vector.broadcast %cst_35 : f32 to vector<8x1xf32>
    %138 = arith.addf %136, %137 : vector<8x1xf32>
    %139 = math.log %138 : vector<8x1xf32>
    %140 = vector.broadcast %139 : vector<8x1xf32> to vector<8x256xf32>
    %141 = arith.subf %140, %134 : vector<8x256xf32>
    %142 = arith.mulf %4, %141 : vector<8x256xf32>
    %143 = vector.shape_cast %142 : vector<8x256xf32> to vector<1x8x256xf32>
    %cst_36 = arith.constant dense<0.000000e+00> : vector<1xf32>
    %144 = vector.multi_reduction <add>, %143, %cst_36 [1, 2] : vector<1x8x256xf32> to vector<1xf32>
    %145 = vector.shape_cast %144 : vector<1xf32> to vector<1x1x1xf32>
    %146 = vector.extract %145[0, 0, 0] : f32 from vector<1x1x1xf32>
    %147 = tpu.iota {dimensions = array<i32: 2>} : vector<1x1x128xi32>
    %cst_37 = arith.constant 0.000000e+00 : f32
    %148 = vector.broadcast %cst_37 : f32 to vector<1x1x128xf32>
    %c0_i32 = arith.constant 0 : i32
    %149 = vector.broadcast %c0_i32 : i32 to vector<1x1x128xi32>
    %150 = arith.cmpi eq, %147, %149 : vector<1x1x128xi32>
    %cst_38 = arith.constant 0.000000e+00 : f32
    %151 = vector.broadcast %146 : f32 to vector<1x1x128xf32>
    %152 = vector.broadcast %cst_38 : f32 to vector<1x1x128xf32>
    %153 = arith.select %150, %151, %152 : vector<1x1x128xi1>, vector<1x1x128xf32>
    %154 = arith.addf %148, %153 : vector<1x1x128xf32>
    %c1_i32 = arith.constant 1 : i32
    %155 = vector.broadcast %c1_i32 : i32 to vector<1x1x128xi32>
    %156 = arith.cmpi eq, %147, %155 : vector<1x1x128xi32>
    %cst_39 = arith.constant 0.000000e+00 : f32
    %157 = vector.broadcast %94 : f32 to vector<1x1x128xf32>
    %158 = vector.broadcast %cst_39 : f32 to vector<1x1x128xf32>
    %159 = arith.select %156, %157, %158 : vector<1x1x128xi1>, vector<1x1x128xf32>
    %160 = arith.addf %154, %159 : vector<1x1x128xf32>
    %c0_40 = arith.constant 0 : index
    %c0_41 = arith.constant 0 : index
    %c0_42 = arith.constant 0 : index
    %c0_43 = arith.constant 0 : index
    %161 = vector.load %arg8[%c0_40, %c0_41, %c0_42, %c0_43] : memref<1x1x1x128xf32, #tpu.memory_space<vmem>>, vector<1x1x1x128xf32>
    %162 = vector.shape_cast %161 : vector<1x1x1x128xf32> to vector<1x1x128xf32>
    %163 = vector.shape_cast %160 : vector<1x1x128xf32> to vector<1x1x1x128xf32>
    tpu.vector_store %arg8[%c0_40, %c0_41, %c0_42, %c0_43], %163 {strides = array<i32>} : memref<1x1x1x128xf32, #tpu.memory_space<vmem>>, vector<1x1x1x128xf32>,
    return
  }
  func.func @transform_0(%arg0: i32, %arg1: i32) -> (i32, i32, i32) {
    %c0_i32 = arith.constant 0 : i32
    %c0_i32_0 = arith.constant 0 : i32
    return %arg1, %arg0, %c0_i32 : i32, i32, i32
  }
  func.func @transform_1(%arg0: i32, %arg1: i32) -> (i32, i32) {
    %c0_i32 = arith.constant 0 : i32
    %c0_i32_0 = arith.constant 0 : i32
    return %arg0, %c0_i32 : i32, i32
  }
  func.func @transform_2(%arg0: i32, %arg1: i32) -> (i32, i32) {
    %c0_i32 = arith.constant 0 : i32
    %c0_i32_0 = arith.constant 0 : i32
    %c0_i32_1 = arith.constant 0 : i32
    return %c0_i32, %c0_i32_0 : i32, i32
  }
  func.func @transform_3(%arg0: i32, %arg1: i32) -> (i32, i32) {
    %c0_i32 = arith.constant 0 : i32
    %c0_i32_0 = arith.constant 0 : i32
    %c0_i32_1 = arith.constant 0 : i32
    return %c0_i32, %c0_i32_0 : i32, i32
  }
  func.func @transform_4(%arg0: i32, %arg1: i32) -> (i32, i32) {
    %c0_i32 = arith.constant 0 : i32
    %c0_i32_0 = arith.constant 0 : i32
    %c0_i32_1 = arith.constant 0 : i32
    return %c0_i32, %c0_i32_0 : i32, i32
  }
  func.func @transform_5(%arg0: i32, %arg1: i32) -> (i32, i32) {
    %c0_i32 = arith.constant 0 : i32
    %c0_i32_0 = arith.constant 0 : i32
    %c0_i32_1 = arith.constant 0 : i32
    return %c0_i32, %c0_i32_0 : i32, i32
  }
  func.func @transform_6(%arg0: i32, %arg1: i32) -> (i32, i32, i32, i32) {
    %c0_i32 = arith.constant 0 : i32
    %c0_i32_0 = arith.constant 0 : i32
    %c0_i32_1 = arith.constant 0 : i32
    return %arg0, %arg1, %c0_i32, %c0_i32_0 : i32, i32, i32, i32
  }
}

</mosaic_0001>

<bundles_post_ra>
// kernel: adv_forward.4
= control target key start
LH: loop header
LB: loop body
LE: loop exit
PB: predicated region body
PF: predicated region fallthrough
CT: control target
= control target key end

     0   :  { %v34_v0 = vlaneseq  ;;  %vm166_vm0 = vcmask 1043456   ;;  %vm371_vm1 = vcmask 523264   ;;  %s1344_s0 = inlined_call_operand.vmem [shape: bf16[8,256], index: 0, kind: input, shape index: {}]   ;;  %s1345_s3 = inlined_call_operand.vmem [shape: f32[4,256], index: 3, kind: input, shape index: {}]   ;;  %s1346_s5 = inlined_call_operand.vmem [shape: bf16[256,64], index: 5, kind: input, shape index: {}]   ;;  %s1347_s4 = inlined_call_operand.vmem [shape: bf16[256,64], index: 4, kind: input, shape index: {}]   ;;  %s1348_s6 = inlined_call_operand.vmem [shape: f32[1,64], index: 6, kind: input, shape index: {}]   ;;  %s1349_s1 = inlined_call_operand.vmem [shape: bf16[8,256], index: 1, kind: input, shape index: {}]   ;;  %s1350_s2 = inlined_call_operand.vmem [shape: bf16[8,256], index: 2, kind: input, shape index: {}]   ;;  %s1351_s7 = inlined_call_operand.vmem [shape: bf16[2,8,256], index: 7, kind: output, shape index: {0}]   ;;  %s1352_s8 = inlined_call_operand.vmem [shape: f32[1,1,128], index: 8, kind: output, shape index: {1}]  }
   0x1   :  { %v29_v1 = vld [vmem:[%s1344_s0] sm:$0xff]  ;;  %v956_v4 = vld [vmem:[%s1346_s5 + $0x78] sm:$0xff]   ;;  %v958_v16 = vld [vmem:[%s1346_s5 + $0x70] sm:$0xff]  }
   0x2   :  { %v32_v2 = vld [vmem:[%s1345_s3] sm:$0xff]  ;;  %v35_v3 = vshrl.u32 %v34_v0, 7  ;;  %v1096_v5 = vunpack.c.l.bf16 %v29_v1  ;;  %v1098_v6 = vunpack.c.h.bf16 %v29_v1  ;;  %v957_v7 = vld [vmem:[%s1346_s5 + $0x38] sm:$0xff]   ;;  %891 = vmatprep.subr.bf16.mxu0 %v956_v4  ;;  %v959_v17 = vld [vmem:[%s1346_s5 + $0x30] sm:$0xff]  }
   0x3   :  { %892 = vmatpush3.bf16.msra.mxu0 %v957_v7  ;;  %v960_v54 = vld [vmem:[%s1346_s5 + $0x68] sm:$0xff]   ;;  %v962_v56 = vld [vmem:[%s1346_s5 + $0x60] sm:$0xff]   ;;  %v964_v58 = vld [vmem:[%s1346_s5 + $0x58] sm:$0xff]  }
   0x4   :  { %v67_v8 = vsub.s32 1, %v35_v3  ;;  %v71_v9 = vsub.s32 5, %v35_v3  ;;  %v36_v10 = vsub.s32 0, %v35_v3  ;;  %v40_v11 = vsub.s32 4, %v35_v3  ;;  %893 = vmatprep.subr.bf16.mxu0 %v958_v16  ;;  %v961_v55 = vld [vmem:[%s1346_s5 + $0x28] sm:$0xff]   ;;  %v963_v57 = vld [vmem:[%s1346_s5 + $0x20] sm:$0xff]  }
   0x5   :  { %v129_v12 = vsub.s32 3, %v35_v3  ;;  %v133_v13 = vsub.s32 7, %v35_v3  ;;  %v98_v14 = vsub.s32 2, %v35_v3  ;;  %v102_v15 = vsub.s32 6, %v35_v3  ;;  %v965_v59 = vld [vmem:[%s1346_s5 + $0x18] sm:$0xff]   ;;  %v966_v60 = vld [vmem:[%s1346_s5 + $0x50] sm:$0xff]  }
   0x6   :  { %v68_v18 = vrot.slane %v32_v2, %v67_v8  ;;  %v72_v19 = vrot.slane %v32_v2, %v71_v9  ;;  %v37_v20 = vrot.slane %v32_v2, %v36_v10  ;;  %v41_v21 = vrot.slane %v32_v2, %v40_v11  ;;  %v967_v61 = vld [vmem:[%s1346_s5 + $0x10] sm:$0xff]   ;;  %v968_v62 = vld [vmem:[%s1346_s5 + $0x48] sm:$0xff]   ;;  %v970_v1 = vld [vmem:[%s1346_s5 + $0x40] sm:$0xff]  }
   0x7   :  { %v130_v22 = vrot.slane %v32_v2, %v129_v12  ;;  %v134_v23 = vrot.slane %v32_v2, %v133_v13  ;;  %v99_v24 = vrot.slane %v32_v2, %v98_v14  ;;  %v103_v25 = vrot.slane %v32_v2, %v102_v15  ;;  %894 = vmatpush3.bf16.msra.mxu0 %v959_v17  ;;  %v969_v63 = vld [vmem:[%s1346_s5 + $0x8] sm:$0xff]   ;;  %v971_v2 = vld [vmem:[%s1346_s5] sm:$0xff]  }
   0x8   :  { %v1109_v26 = vrot.slane %v68_v18, %v67_v8  ;;  %v1111_v27 = vrot.slane %v72_v19, %v67_v8  ;;  %v1113_v28 = vrot.slane %v37_v20, %v36_v10  ;;  %v1115_v29 = vrot.slane %v41_v21, %v36_v10  ;;  %895 = vmatprep.subr.bf16.mxu0 %v960_v54 }
   0x9   :  { %v1117_v30 = vrot.slane %v130_v22, %v129_v12  ;;  %v1119_v31 = vrot.slane %v134_v23, %v129_v12  ;;  %v1121_v32 = vrot.slane %v99_v24, %v98_v14  ;;  %v1123_v33 = vrot.slane %v103_v25, %v98_v14 }
   0xa   :  { %v1127_v34 = vmul.f32 %v1109_v26, %v1096_v5  ;;  %v84_v35 = vmul.f32 %v1111_v27, %v1098_v6  ;;  %v1133_v36 = vmul.f32 %v1113_v28, %v1096_v5  ;;  %v1137_v37 = vmul.f32 %v1115_v29, %v1098_v6 }
   0xb   :  { %v1141_v38 = vmul.f32 %v1117_v30, %v1096_v5  ;;  %v146_v39 = vmul.f32 %v1119_v31, %v1098_v6  ;;  %v1147_v40 = vmul.f32 %v1121_v32, %v1096_v5  ;;  %v1151_v41 = vmul.f32 %v1123_v33, %v1098_v6  ;;  %896 = vmatpush3.bf16.msra.mxu0 %v961_v55  ;;  %v976_v55 = vld [vmem:[%s1347_s4 + $0x68] sm:$0xff]  }
   0xc   :  { %v85_v42 = vmul.f32 %v1127_v34, %v1127_v34  ;;  %v86_v43 = vmul.f32 %v84_v35, %v84_v35  ;;  %v54_v44 = vmul.f32 %v1133_v36, %v1133_v36  ;;  %v55_v45 = vmul.f32 %v1137_v37, %v1137_v37  ;;  %897 = vmatprep.subr.bf16.mxu0 %v962_v56  ;;  %v977_v56 = vld [vmem:[%s1347_s4 + $0x28] sm:$0xff]  }
   0xd   :  { %v147_v46 = vmul.f32 %v1141_v38, %v1141_v38  ;;  %v148_v47 = vmul.f32 %v146_v39, %v146_v39  ;;  %v116_v48 = vmul.f32 %v1147_v40, %v1147_v40  ;;  %v117_v49 = vmul.f32 %v1151_v41, %v1151_v41 }
   0xe   :  { %v87_v50 = vadd.f32 %v86_v43, %v85_v42  ;;  %v56_v52 = vadd.f32 %v55_v45, %v54_v44  ;;  %vm665_vm2 = vcmp.eq.f32.partialorder %v1096_v5, 1.0  ;;  %vm663_vm3 = vcmp.eq.f32.partialorder %v1096_v5, 0.0 }
   0xf   :  { %v149_v51 = vadd.f32 %v148_v47, %v147_v46  ;;  %v118_v53 = vadd.f32 %v117_v49, %v116_v48  ;;  %898 = vmatpush3.bf16.msra.mxu0 %v963_v57  ;;  %v532_v57 = vsel %vm371_vm1, %v977_v56, 0  ;;  %vm664_vm4 = vcmp.eq.f32.partialorder %v1098_v6, 0.0 }
  0x10   :  { %88 = vadd.xlane.f32.xlu0 %v87_v50  ;;  %899 = vmatprep.subr.bf16.mxu0 %v964_v58  ;;  %v972_v50 = vld [vmem:[%s1347_s4 + $0x78] sm:$0xff]   ;;  %v978_v58 = vld [vmem:[%s1347_s4 + $0x60] sm:$0xff]   ;;  %vm666_vm5 = vcmp.eq.f32.partialorder %v1098_v6, 1.0 }
  0x11   :  { %150 = vadd.xlane.f32.xlu1 %v149_v51  ;;  %v973_v51 = vld [vmem:[%s1347_s4 + $0x38] sm:$0xff]   ;;  %939 = vmatprep.subr.msk.bf16.mxu1 %vm371_vm1, %v972_v50 }
  0x13   :  { %900 = vmatpush3.bf16.msra.mxu0 %v965_v59  ;;  %v979_v59 = vld [vmem:[%s1347_s4 + $0x20] sm:$0xff]  }
  0x14   :  { %57 = vadd.xlane.f32.xlu0 %v56_v52  ;;  %901 = vmatprep.subr.bf16.mxu0 %v966_v60  ;;  %v538_v52 = vsel %vm371_vm1, %v973_v51, 0  ;;  %v529_v60 = vsel %vm371_vm1, %v979_v59, 0 }
  0x15   :  { %119 = vadd.xlane.f32.xlu1 %v118_v53  ;;  %920 = vmatpush3.bf16.xpose.msra.mxu1 %v538_v52  ;;  %v975_v53 = vld [vmem:[%s1347_s4 + $0x30] sm:$0xff]  }
  0x16   :  { %v535_v54 = vsel %vm371_vm1, %v975_v53, 0 }
  0x17   :  { %902 = vmatpush3.bf16.msra.mxu0 %v967_v61  ;;  %v980_v61 = vld [vmem:[%s1347_s4 + $0x58] sm:$0xff]  }
  0x18   :  { %903 = vmatprep.subr.bf16.mxu0 %v968_v62  ;;  %v981_v62 = vld [vmem:[%s1347_s4 + $0x18] sm:$0xff]  }
  0x1b   :  { %904 = vmatpush3.bf16.msra.mxu0 %v969_v63  ;;  %v526_v63 = vsel %vm371_vm1, %v981_v62, 0 }
  0x1c   :  { %905 = vmatprep.subr.bf16.mxu0 %v970_v1 }
  0x1f   :  { %906 = vmatpush3.bf16.msra.mxu0 %v971_v2  ;;  %v843_v2 = vld [vmem:[%s1348_s6] ss:$0 sm:$0xff] }
  0x99   :  { %v89_v3 = vpop.xlane.xlu0 %88 }
  0x9a   :  { %v90_v4 = vadd.f32 1e-12, %v89_v3  ;;  %v151_v7 = vpop.xlane.xlu1 %150 }
  0x9b   :  { %v152_v8 = vadd.f32 1e-12, %v151_v7 }
  0x9c   :  { %988 = vrsqrt.f32 %v90_v4 }
  0x9d   :  { %v58_v9 = vpop.xlane.xlu0 %57  ;;  %990 = vrsqrt.f32 %v152_v8 }
  0x9e   :  { %v59_v10 = vadd.f32 1e-12, %v58_v9  ;;  %v120_v11 = vpop.xlane.xlu1 %119 }
  0x9f   :  { %v121_v12 = vadd.f32 1e-12, %v120_v11 }
  0xa0   :  { %992 = vrsqrt.f32 %v59_v10 }
  0xa1   :  { %994 = vrsqrt.f32 %v121_v12 }
  0xa9   :  { %v989_v13 = vpop.eup %988 }
  0xaa   :  { %v991_v14 = vpop.eup %990  ;;  %v93_v15 = vmul.f32 %v989_v13, %v84_v35  ;;  %v92_v16 = vmul.f32 %v989_v13, %v1127_v34 }
  0xab   :  { %v155_v17 = vmul.f32 %v991_v14, %v146_v39  ;;  %v154_v43 = vmul.f32 %v991_v14, %v1141_v38 }
  0xac   :  { %v95_v18 = vpack.c.bf16 %v93_v15, %v93_v15  ;;  %v94_v19 = vpack.c.bf16 %v92_v16, %v92_v16 }
  0xad   :  { %v993_v20 = vpop.eup %992  ;;  %v157_v21 = vpack.c.bf16 %v155_v17, %v155_v17  ;;  %v156_v48 = vpack.c.bf16 %v154_v43, %v154_v43  ;;  %v982_v43 = vld [vmem:[%s1347_s4 + $0x50] sm:$0xff]  }
  0xae   :  { %v995_v22 = vpop.eup %994  ;;  %v62_v23 = vmul.f32 %v993_v20, %v1137_v37  ;;  %v61_v24 = vmul.f32 %v993_v20, %v1133_v36  ;;  %v161_v35 = vrot.slane %v95_v18, 4  ;;  %v160_v34 = vrot.slane %v94_v19, 4 }
  0xaf   :  { %v124_v25 = vmul.f32 %v995_v22, %v1151_v41  ;;  %v165_v42 = vrot.slane %v157_v21, 4  ;;  %v123_v36 = vmul.f32 %v995_v22, %v1147_v40  ;;  %v164_v49 = vrot.slane %v156_v48, 4  ;;  %v974_v40 = vld [vmem:[%s1347_s4 + $0x70] sm:$0xff]  }
  0xb0   :  { %v64_v44 = vpack.c.bf16 %v62_v23, %v62_v23  ;;  %v63_v45 = vpack.c.bf16 %v61_v24, %v61_v24  ;;  %940 = vmatprep.subr.msk.bf16.mxu1 %vm371_vm1, %v974_v40 }
  0xb1   :  { %v126_v39 = vpack.c.bf16 %v124_v25, %v124_v25  ;;  %v125_v41 = vpack.c.bf16 %v123_v36, %v123_v36  ;;  %922 = vmatpush3.bf16.xpose.msra.mxu1 %v535_v54 }
  0xb2   :  { %v173_v46 = vsel %vm166_vm0, %v64_v44, %v161_v35  ;;  %v169_v47 = vsel %vm166_vm0, %v63_v45, %v160_v34  ;;  %941 = vmatprep.subr.msk.bf16.mxu1 %vm371_vm1, %v976_v55  ;;  %v983_v44 = vld [vmem:[%s1347_s4 + $0x10] sm:$0xff]   ;;  %v984_v34 = vld [vmem:[%s1347_s4 + $0x48] sm:$0xff]  }
  0xb3   :  { %350 = vmatprep.mubr.bf16.mxu0 %v173_v46  ;;  %v181_v37 = vsel %vm166_vm0, %v126_v39, %v165_v42  ;;  %v177_v38 = vsel %vm166_vm0, %v125_v41, %v164_v49  ;;  %v523_v45 = vsel %vm371_vm1, %v983_v44, 0  ;;  %v985_v39 = vld [vmem:[%s1347_s4 + $0x8] sm:$0xff]  }
  0xb4   :  { %351 = vmatmul.mubr.bf16.vlgmr.msra.gmra.mxu0 %v169_v47  ;;  %v520_v46 = vsel %vm371_vm1, %v985_v39, 0  ;;  %v986_v47 = vld [vmem:[%s1347_s4 + $0x40] sm:$0xff]  }
  0xb5   :  { %358 = vmatprep.mubr.bf16.mxu0 %v181_v37  ;;  %v987_v37 = vld [vmem:[%s1347_s4] sm:$0xff]  }
  0xb6   :  { %v517_v36 = vsel %vm371_vm1, %v987_v37, 0 }
  0xb9   :  { %924 = vmatpush3.bf16.xpose.msra.mxu1 %v532_v57 }
  0xba   :  { %942 = vmatprep.subr.msk.bf16.mxu1 %vm371_vm1, %v978_v58 }
  0xbc   :  { %359 = vmatmul.mubr.bf16.gmra.mxu0 %v177_v38 }
  0xc1   :  { %926 = vmatpush3.bf16.xpose.msra.mxu1 %v529_v60 }
  0xc2   :  { %943 = vmatprep.subr.msk.bf16.mxu1 %vm371_vm1, %v980_v61 }
  0xc9   :  { %928 = vmatpush3.bf16.xpose.msra.mxu1 %v526_v63 }
  0xca   :  { %944 = vmatprep.subr.msk.bf16.mxu1 %vm371_vm1, %v982_v43 }
  0xd1   :  { %930 = vmatpush3.bf16.xpose.msra.mxu1 %v523_v45 }
  0xd2   :  { %945 = vmatprep.subr.msk.bf16.mxu1 %vm371_vm1, %v984_v34 }
  0xd9   :  { %932 = vmatpush3.bf16.xpose.msra.mxu1 %v520_v46 }
  0xda   :  { %946 = vmatprep.subr.msk.bf16.mxu1 %vm371_vm1, %v986_v47 }
  0xe1   :  { %934 = vmatpush3.bf16.xpose.msra.mxu1 %v517_v36 }
 0x174   :  { %v907_v1 = vpop.f32.mrf.mxu0 }
 0x176   :  { %v908_v3 = vpop.f32.mrf.mxu0 }
 0x177   :  { %v909_v4 = vadd.f32 %v908_v3, %v907_v1 }
 0x178   :  { %v910_v7 = vpop.f32.mrf.mxu0 }
 0x179   :  { %v353_v8 = vadd.f32 %v909_v4, %v843_v2 }
 0x17a   :  { %v911_v9 = vpop.f32.mrf.mxu0 }
 0x17b   :  { %v912_v10 = vadd.f32 %v911_v9, %v910_v7  ;;  %v367_v11 = vmul.f32 %v353_v8, %v353_v8 }
 0x17c   :  { %v913_v12 = vpop.f32.mrf.mxu0 }
 0x17d   :  { %v356_v13 = vadd.f32 %v912_v10, %v843_v2  ;;  %v372_v14 = vsel %vm371_vm1, %v367_v11, 0.0 }
 0x17e   :  { %v914_v15 = vpop.f32.mrf.mxu0  ;;  %373 = vadd.xlane.f32.xlu0 %v372_v14 }
 0x17f   :  { %v915_v16 = vadd.f32 %v914_v15, %v913_v12  ;;  %v368_v17 = vmul.f32 %v356_v13, %v356_v13 }
 0x180   :  { %v916_v18 = vpop.f32.mrf.mxu0 }
 0x181   :  { %v361_v19 = vadd.f32 %v915_v16, %v843_v2  ;;  %v375_v20 = vsel %vm371_vm1, %v368_v17, 0.0 }
 0x182   :  { %v917_v21 = vpop.f32.mrf.mxu0  ;;  %376 = vadd.xlane.f32.xlu1 %v375_v20 }
 0x183   :  { %v918_v22 = vadd.f32 %v917_v21, %v916_v18  ;;  %v369_v23 = vmul.f32 %v361_v19, %v361_v19 }
 0x185   :  { %v364_v24 = vadd.f32 %v918_v22, %v843_v2  ;;  %v378_v25 = vsel %vm371_vm1, %v369_v23, 0.0 }
 0x186   :  { %379 = vadd.xlane.f32.xlu0 %v378_v25 }
 0x187   :  { %v370_v42 = vmul.f32 %v364_v24, %v364_v24 }
 0x189   :  { %v381_v35 = vsel %vm371_vm1, %v370_v42, 0.0 }
 0x18a   :  { %382 = vadd.xlane.f32.xlu1 %v381_v35 }
 0x207   :  { %v374_v48 = vpop.xlane.xlu0 %373 }
 0x208   :  { %v384_v41 = vadd.f32 1e-12, %v374_v48 }
 0x20a   :  { %996 = vrsqrt.f32 %v384_v41 }
 0x20b   :  { %v377_v49 = vpop.xlane.xlu1 %376 }
 0x20c   :  { %v385_v38 = vadd.f32 1e-12, %v377_v49 }
 0x20e   :  { %998 = vrsqrt.f32 %v385_v38 }
 0x20f   :  { %v380_v50 = vpop.xlane.xlu0 %379 }
 0x210   :  { %v386_v51 = vadd.f32 1e-12, %v380_v50 }
 0x212   :  { %1000 = vrsqrt.f32 %v386_v51 }
 0x213   :  { %v383_v40 = vpop.xlane.xlu1 %382 }
 0x214   :  { %v387_v52 = vadd.f32 1e-12, %v383_v40 }
 0x216   :  { %1002 = vrsqrt.f32 %v387_v52 }
 0x217   :  { %v997_v53 = vpop.eup %996 }
 0x218   :  { %v392_v55 = vmul.f32 %v997_v53, %v353_v8 }
 0x21b   :  { %v999_v54 = vpop.eup %998 }
 0x21c   :  { %v393_v56 = vmul.f32 %v999_v54, %v356_v13 }
 0x21e   :  { %v396_v57 = vpack.c.bf16 %v393_v56, %v392_v55 }
 0x21f   :  { %v1001_v58 = vpop.eup %1000 }
 0x220   :  { %935 = vmatprep.mubr.msk.bf16.mxu1 %vm371_vm1, %v396_v57  ;;  %v394_v60 = vmul.f32 %v1001_v58, %v361_v19 }
 0x221   :  { %936 = vmatmul.mubr.msk.bf16.vlgmr.msra.gmra.mxu1 %vm371_vm1, %v396_v57 }
 0x223   :  { %v1003_v59 = vpop.eup %1002 }
 0x224   :  { %v395_v61 = vmul.f32 %v1003_v59, %v364_v24 }
 0x226   :  { %v397_v62 = vpack.c.bf16 %v395_v61, %v394_v60 }
 0x228   :  { %937 = vmatprep.mubr.msk.bf16.mxu1 %vm371_vm1, %v397_v62 }
 0x229   :  { %938 = vmatmul.mubr.msk.bf16.gmra.mxu1 %vm371_vm1, %v397_v62 }
 0x2e1   :  { %v598_v63 = vpop.f32.mrf.mxu1 }
 0x2e2   :  { %v617_v1 = vmul.f32 10.0, %v598_v63 }
 0x2e3   :  { %v600_v2 = vpop.f32.mrf.mxu1 }
 0x2e4   :  { %v618_v3 = vmul.f32 10.0, %v600_v2  ;;  %v625_v8 = vmul.f32 1.442695, %v617_v1 }
 0x2e5   :  { %v602_v4 = vpop.f32.mrf.mxu1 }
 0x2e6   :  { %v619_v7 = vmul.f32 10.0, %v602_v4  ;;  %v627_v12 = vmul.f32 1.442695, %v618_v3 }
 0x2e7   :  { %v604_v9 = vpop.f32.mrf.mxu1 }
 0x2e8   :  { %v629_v10 = vmul.f32 1.442695, %v619_v7  ;;  %v620_v11 = vmul.f32 10.0, %v604_v9 }
 0x2e9   :  { %v608_v13 = vpop.f32.mrf.mxu1 }
 0x2ea   :  { %1004 = vpow2.f32 %v629_v10  ;;  %v631_v14 = vmul.f32 1.442695, %v620_v11  ;;  %v621_v15 = vmul.f32 10.0, %v608_v13 }
 0x2eb   :  { %1006 = vpow2.f32 %v625_v8  ;;  %v610_v16 = vpop.f32.mrf.mxu1 }
 0x2ec   :  { %1008 = vpow2.f32 %v631_v14  ;;  %v633_v17 = vmul.f32 1.442695, %v621_v15  ;;  %v622_v18 = vmul.f32 10.0, %v610_v16 }
 0x2ed   :  { %1010 = vpow2.f32 %v627_v12  ;;  %v612_v19 = vpop.f32.mrf.mxu1 }
 0x2ee   :  { %1012 = vpow2.f32 %v633_v17  ;;  %v635_v20 = vmul.f32 1.442695, %v622_v18  ;;  %v623_v21 = vmul.f32 10.0, %v612_v19  ;;  %v686_v19 = vsub.f32 1.0, %v1096_v5 }
 0x2ef   :  { %v614_v22 = vpop.f32.mrf.mxu1 }
 0x2f0   :  { %1014 = vpow2.f32 %v635_v20  ;;  %v637_v23 = vmul.f32 1.442695, %v623_v21  ;;  %v624_v24 = vmul.f32 10.0, %v614_v22  ;;  %v687_v20 = vsub.f32 1.0, %v1098_v6 }
 0x2f2   :  { %1016 = vpow2.f32 %v637_v23  ;;  %v639_v25 = vmul.f32 1.442695, %v624_v24 }
 0x2f4   :  { %1018 = vpow2.f32 %v639_v25 }
 0x2f7   :  { %v1005_v42 = vpop.eup %1004 }
 0x2f8   :  { %v1007_v43 = vpop.eup %1006  ;;  %v645_v45 = vmul.f32 %v1005_v42, %v1109_v26 }
 0x2f9   :  { %v1009_v44 = vpop.eup %1008  ;;  %v641_v39 = vmul.f32 %v1007_v43, %v1113_v28 }
 0x2fa   :  { %v1011_v35 = vpop.eup %1010  ;;  %v646_v46 = vmul.f32 %v1009_v44, %v1111_v27 }
 0x2fb   :  { %v1013_v34 = vpop.eup %1012  ;;  %v642_v36 = vmul.f32 %v1011_v35, %v1115_v29  ;;  %v647_v48 = vadd.f32 %v645_v45, %v641_v39  ;;  %v667_v29 = vld [vmem:[%s1349_s1] sm:$0xff] }
 0x2fc   :  { %v649_v47 = vmul.f32 %v1013_v34, %v1121_v32  ;;  %v668_v54 = vunpack.c.l.bf16 %v667_v29  ;;  %v669_v57 = vunpack.c.h.bf16 %v667_v29 }
 0x2fd   :  { %v1015_v37 = vpop.eup %1014  ;;  %v648_v38 = vadd.f32 %v646_v46, %v642_v36 }
 0x2fe   :  { %v650_v41 = vmul.f32 %v1015_v37, %v1123_v33  ;;  %v651_v50 = vadd.f32 %v649_v47, %v647_v48  ;;  %v698_v33 = vld [vmem:[%s1350_s2] sm:$0xff] }
 0x2ff   :  { %v1017_v49 = vpop.eup %1016  ;;  %v700_v58 = vunpack.c.h.bf16 %v698_v33 }
 0x300   :  { %v653_v51 = vmul.f32 %v1017_v49, %v1117_v30  ;;  %v652_v26 = vadd.f32 %v650_v41, %v648_v38  ;;  %v699_v30 = vunpack.c.l.bf16 %v698_v33 }
 0x301   :  { %v1019_v40 = vpop.eup %1018 }
 0x302   :  { %v655_v52 = vadd.f32 %v653_v51, %v651_v50  ;;  %v654_v28 = vmul.f32 %v1019_v40, %v1119_v31 }
 0x304   :  { %v657_v53 = vadd.f32 1e-12, %v655_v52  ;;  %v656_v27 = vadd.f32 %v654_v28, %v652_v26  ;;  %v1040_v26 = vmov 0.0  }
 0x305   :  { %v885_v52 = vsel %vm663_vm3, 1.0, %v1040_v26  ;;  %v886_v28 = vsel %vm664_vm4, 1.0, %v1040_v26 }
 0x306   :  { %1020 = vlog2.f32 %v657_v53  ;;  %v658_v32 = vadd.f32 1e-12, %v656_v27 }
 0x308   :  { %1022 = vlog2.f32 %v658_v32 }
 0x313   :  { %v1021_v55 = vpop.eup %1020 }
 0x314   :  { %v660_v56 = vmul.f32 0.6931472, %v1021_v55 }
 0x315   :  { %v1023_v31 = vpop.eup %1022 }
 0x316   :  { %v670_v59 = vadd.f32 %v668_v54, %v660_v56  ;;  %v701_v60 = vadd.f32 %v699_v30, %v660_v56  ;;  %v662_v61 = vmul.f32 0.6931472, %v1023_v31  ;;  %v888_v31 = vsel %vm666_vm5, 1.0, %v1040_v26 }
 0x318   :  { %v878_v62 = vmul.f32 -5.0, %v670_v59  ;;  %v880_v63 = vmul.f32 -5.0, %v701_v60  ;;  %v671_v1 = vadd.f32 %v669_v57, %v662_v61  ;;  %v702_v2 = vadd.f32 %v700_v58, %v662_v61 }
 0x319   :  { %v887_v58 = vsel %vm665_vm2, 1.0, %v1040_v26 }
 0x31a   :  { %v676_v3 = vmul.f32 1.442695, %v878_v62  ;;  %v707_v4 = vmul.f32 1.442695, %v880_v63  ;;  %v879_v7 = vmul.f32 -5.0, %v671_v1  ;;  %v881_v8 = vmul.f32 -5.0, %v702_v2 }
 0x31b   :  { %v796_v63 = vadd.f32 %v886_v28, %v885_v52  ;;  %v806_v2 = vadd.f32 %v888_v31, %v887_v58 }
 0x31c   :  { %1024 = vpow2.f32 %v676_v3  ;;  %v678_v9 = vmul.f32 1.442695, %v879_v7  ;;  %v709_v10 = vmul.f32 1.442695, %v881_v8 }
 0x31d   :  { %1026 = vpow2.f32 %v707_v4 }
 0x31e   :  { %1028 = vpow2.f32 %v678_v9 }
 0x31f   :  { %1030 = vpow2.f32 %v709_v10 }
 0x329   :  { %v1025_v11 = vpop.eup %1024 }
 0x32a   :  { %v1027_v12 = vpop.eup %1026  ;;  %v680_v13 = vadd.f32 1.0, %v1025_v11 }
 0x32b   :  { %v1029_v14 = vpop.eup %1028  ;;  %v711_v15 = vadd.f32 1.0, %v1027_v12 }
 0x32c   :  { %v1031_v16 = vpop.eup %1030  ;;  %v681_v17 = vadd.f32 1.0, %v1029_v14  ;;  %1032 = vrcp.f32 %v680_v13 }
 0x32d   :  { %v712_v18 = vadd.f32 1.0, %v1031_v16  ;;  %1034 = vrcp.f32 %v711_v15 }
 0x32e   :  { %1036 = vrcp.f32 %v681_v17 }
 0x32f   :  { %1038 = vrcp.f32 %v712_v18 }
 0x339   :  { %v1033_v21 = vpop.eup %1032 }
 0x33a   :  { %v1035_v22 = vpop.eup %1034  ;;  %v688_v23 = vmul.f32 %v1033_v21, %v686_v19  ;;  %v692_v24 = vmul.f32 %v1033_v21, %v1096_v5 }
 0x33b   :  { %v1037_v25 = vpop.eup %1036  ;;  %v717_v42 = vmul.f32 %v1035_v22, %v686_v19  ;;  %v721_v43 = vmul.f32 %v1035_v22, %v1096_v5 }
 0x33c   :  { %v1039_v44 = vpop.eup %1038  ;;  %v689_v35 = vmul.f32 %v1037_v25, %v687_v20  ;;  %v690_v45 = vsub.f32 1.0, %v688_v23  ;;  %v693_v34 = vmul.f32 %v1037_v25, %v1098_v6  ;;  %v694_v39 = vsel %vm665_vm2, %v692_v24, 0.0 }
 0x33d   :  { %v718_v46 = vmul.f32 %v1039_v44, %v687_v20  ;;  %v719_v47 = vsub.f32 1.0, %v717_v42  ;;  %v722_v37 = vmul.f32 %v1039_v44, %v1098_v6  ;;  %v723_v49 = vsel %vm665_vm2, %v721_v43, 0.0 }
 0x33e   :  { %v691_v36 = vsub.f32 1.0, %v689_v35  ;;  %v695_v48 = vsel %vm666_vm5, %v693_v34, 0.0  ;;  %v696_v41 = vsel %vm663_vm3, %v690_v45, %v694_v39  ;;  %v817_v34 = vand.u32 127, %v34_v0 }
 0x33f   :  { %v720_v38 = vsub.f32 1.0, %v718_v46  ;;  %v724_v50 = vsel %vm666_vm5, %v722_v37, 0.0  ;;  %v766_v51 = vand.u32 2147483647, %v696_v41  ;;  %v780_v53 = vsub.f32 1.0, %v696_v41 }
 0x340   :  { %v697_v40 = vsel %vm664_vm4, %v691_v36, %v695_v48  ;;  %v725_v27 = vsel %vm663_vm3, %v719_v47, %v723_v49  ;;  %vm818_vm6 = vcmp.eq.s32.totalorder %v817_v34, 0  ;;  %vm822_vm7 = vcmp.eq.s32.totalorder %v817_v34, 1 }
 0x341   :  { %v726_v32 = vsel %vm664_vm4, %v720_v38, %v724_v50  ;;  %v767_v29 = vand.u32 2147483647, %v697_v40  ;;  %v889_v33 = vpack.c.bf16 %v697_v40, %v696_v41  ;;  %v781_v30 = vsub.f32 1.0, %v697_v40 }
 0x342   :  { %v890_v54 = vpack.c.bf16 %v726_v32, %v725_v27  ;;  %v782_v55 = vand.u32 2147483647, %v780_v53  ;;  %v768_v56 = vmul.f32 %v885_v52, %v766_v51  ;;  %vm826_vm8 = vcmp.eq.s32.totalorder %v817_v34, 2 }
 0x343   :  { %v769_v57 = vmul.f32 %v886_v28, %v767_v29  ;;  %735 = vst [vmem:[%s1351_s7] sm:$0xff] %v889_v33  ;;  %v783_v59 = vand.u32 2147483647, %v781_v30  ;;  %vm830_vm9 = vcmp.eq.s32.totalorder %v817_v34, 3 }
 0x344   :  { %884 = vst [vmem:[%s1351_s7 + $0x8] sm:$0xff] %v890_v54  ;;  %v784_v61 = vmul.f32 %v887_v58, %v782_v55 }
 0x345   :  { %v770_v60 = vadd.f32 %v769_v57, %v768_v56  ;;  %v785_v62 = vmul.f32 %v888_v31, %v783_v59 }
 0x347   :  { %771 = vadd.xlane.f32.xlu0 %v770_v60  ;;  %v786_v1 = vadd.f32 %v785_v62, %v784_v61 }
 0x349   :  { %787 = vadd.xlane.f32.xlu1 %v786_v1 }
 0x34b   :  { %797 = vadd.xlane.f32.xlu0 %v796_v63 }
 0x34d   :  { %807 = vadd.xlane.f32.xlu1 %v806_v2 }
 0x3d0   :  { %v772_v5 = vpop.xlane.xlu0 %771 }
 0x3d1   :  { %v773_v3 = vrot.slane %v772_v5, 4 }
 0x3d2   :  { %v788_v6 = vpop.xlane.xlu1 %787 }
 0x3d3   :  { %v774_v4 = vadd.f32 %v773_v3, %v772_v5  ;;  %v789_v7 = vrot.slane %v788_v6, 4 }
 0x3d4   :  { %v798_v8 = vpop.xlane.xlu0 %797 }
 0x3d5   :  { %v775_v9 = vrot.slane %v774_v4, 2  ;;  %v799_v10 = vrot.slane %v798_v8, 4  ;;  %v790_v11 = vadd.f32 %v789_v7, %v788_v6 }
 0x3d6   :  { %v808_v13 = vpop.xlane.xlu1 %807 }
 0x3d7   :  { %v800_v12 = vadd.f32 %v799_v10, %v798_v8  ;;  %v776_v14 = vadd.f32 %v775_v9, %v774_v4  ;;  %v791_v15 = vrot.slane %v790_v11, 2  ;;  %v809_v16 = vrot.slane %v808_v13, 4 }
 0x3d9   :  { %v801_v17 = vrot.slane %v800_v12, 2  ;;  %v777_v18 = vrot.slane %v776_v14, 1  ;;  %v810_v19 = vadd.f32 %v809_v16, %v808_v13  ;;  %v792_v20 = vadd.f32 %v791_v15, %v790_v11 }
 0x3db   :  { %v802_v21 = vadd.f32 %v801_v17, %v800_v12  ;;  %v778_v22 = vadd.f32 %v777_v18, %v776_v14  ;;  %v811_v23 = vrot.slane %v810_v19, 2  ;;  %v793_v24 = vrot.slane %v792_v20, 1 }
 0x3dd   :  { %947 = vpush %v778_v22  ;;  %v803_v25 = vrot.slane %v802_v21, 1  ;;  %v812_v42 = vadd.f32 %v811_v23, %v810_v19  ;;  %v794_v43 = vadd.f32 %v793_v24, %v792_v20 }
 0x3df   :  { %v804_v44 = vadd.f32 %v803_v25, %v802_v21  ;;  %949 = vpush %v794_v43  ;;  %v813_v35 = vrot.slane %v812_v42, 1 }
 0x3e1   :  { %951 = vpush %v804_v44  ;;  %v814_v45 = vadd.f32 %v813_v35, %v812_v42 }
 0x3e3   :  { %953 = vpush %v814_v45 }
 0x40e   :  { %s948_s7 = spop %947 }
 0x40f   :  { %v819_v39 = vstv %s948_s7 }
 0x410   :  { %s950_s27 = spop %949  ;;  %v820_v47 = vsel %vm818_vm6, %v819_v39, 0.0 }
 0x411   :  { %v823_v46 = vstv %s950_s27 }
 0x412   :  { %s952_s28 = spop %951  ;;  %v824_v37 = vsel %vm822_vm7, %v823_v46, 0.0 }
 0x413   :  { %v827_v36 = vstv %s952_s28  ;;  %v825_v48 = vadd.f32 %v824_v37, %v820_v47 }
 0x414   :  { %v828_v41 = vsel %vm826_vm8, %v827_v36, 0.0  ;;  %s954_s29 = spop %953 }
 0x415   :  { %v829_v49 = vadd.f32 %v828_v41, %v825_v48  ;;  %v831_v38 = vstv %s954_s29 }
 0x416   :  { %v832_v50 = vsel %vm830_vm9, %v831_v38, 0.0 }
 0x417   :  { %v833_v51 = vadd.f32 %v832_v50, %v829_v49 }
 0x419   :  { %834 = vst [vmem:[%s1352_s8] sm:$0x1] %v833_v51 }

// kernel: adv_forward.5
= control target key start
LH: loop header
LB: loop body
LE: loop exit
PB: predicated region body
PF: predicated region fallthrough
CT: control target
= control target key end

     0   :  { %s1366_s21 = smov 0   ;;  %s1368_s22 = smov 0   ;;  %s1629_s0 = inlined_call_operand.vmem [shape: bf16[2,8,256], index: 0, kind: input, shape index: {}]   ;;  %s1630_s1 = inlined_call_operand.vmem [shape: bf16[8,256], index: 1, kind: input, shape index: {}]   ;;  %s1631_s2 = inlined_call_operand.vmem [shape: f32[4,256], index: 2, kind: input, shape index: {}]   ;;  %s1632_s3 = inlined_call_operand.vmem [shape: bf16[256,128], index: 3, kind: input, shape index: {}]   ;;  %s1633_s4 = inlined_call_operand.vmem [shape: bf16[256,128], index: 4, kind: input, shape index: {}]   ;;  %s1634_s5 = inlined_call_operand.vmem [shape: f32[1,128], index: 5, kind: input, shape index: {}]   ;;  %s1635_s6 = inlined_call_operand.vmem [shape: f32[1,2,1,128], index: 6, kind: output, shape index: {}]  }
   0x1   :  { %s1370_s23 = smov 0  }
   0x2 LB: > { %s25_s24 = sadd.s32 1, %s1323_s22  ;;  %p1104_p0 = scmp.ge.s32.totalorder %s1327_s23, 1  ;;  %s1327_s23 = sphi %s1370_s23, %s16_s23   ;;  %s1323_s22 = sphi %s1368_s22, %s1637_s22   ;;  %s1319_s21 = sphi %s1366_s21, %s1636_s21  }
   0x3   : > { %p26_p1 = scmp.ge.s32.totalorder %s25_s24, 2  ;;  %p242_p2 = scmp.lt.s32.totalorder %s1327_s23, 3 }
   0x5   : > { %s1639_s24 = smov (%p26_p1, %s25_s24), 0  ;;  %p243_p3 = pnand %p1104_p0, %p242_p2 }
   0x6   : > { %p283_p4 = scmp.lt.s32.totalorder (!%p243_p3), %s1319_s21, 1 }
   0x7   : > { %246 = sbr.rel (%p243_p3) target bundleno = 1155 (0x483), region = 44 }
   0xc   : > { %v313_v0 = vlaneseq  ;;  %v311_v1 = vld [vmem:[%s1631_s2] sm:$0xff]  ;;  %v1227_v2 = vld [vmem:[%s1633_s4 + $0x78] sm:$0xff]   ;;  %s1641_s21 = smov (!%p283_p4, %s1319_s21), 1  ;;  %v1229_v5 = vld [vmem:[%s1633_s4 + $0x70] sm:$0xff]   ;;  %vm445_vm0 = vcmask 1043456  }
   0xd   : > { %v1228_v4 = vld [vmem:[%s1633_s4 + $0x38] sm:$0xff]   ;;  %1147 = vmatprep.subr.bf16.mxu0 %v1227_v2  ;;  %s1146_s9 = sshll.u32 %s1641_s21, 3  ;;  %v1230_v10 = vld [vmem:[%s1633_s4 + $0x30] sm:$0xff]   ;;  %v1231_v54 = vld [vmem:[%s1633_s4 + $0x68] sm:$0xff]   ;;  %s303_s19 = scalar_lea.vmem %s1635_s6, %s1641_s21 }
   0xe   : > { %v314_v3 = vshrl.u32 %v313_v0, 7  ;;  %1148 = vmatpush3.bf16.msra.mxu0 %v1228_v4  ;;  %s291_s14 = scalar_lea.vmem %s1629_s0, %s1146_s9  ;;  %v1232_v55 = vld [vmem:[%s1633_s4 + $0x28] sm:$0xff]   ;;  %v1233_v56 = vld [vmem:[%s1633_s4 + $0x60] sm:$0xff]   ;;  %v1235_v58 = vld [vmem:[%s1633_s4 + $0x58] sm:$0xff]  }
   0xf   : > { %1149 = vmatprep.subr.bf16.mxu0 %v1229_v5  ;;  %v305_v15 = vld [vmem:[%s291_s14] sm:$0xff]  ;;  %v1236_v59 = vld [vmem:[%s1633_s4 + $0x18] sm:$0xff]   ;;  %v1237_v60 = vld [vmem:[%s1633_s4 + $0x50] sm:$0xff]  }
  0x10   : > { %v346_v6 = vsub.s32 1, %v314_v3  ;;  %v350_v7 = vsub.s32 5, %v314_v3  ;;  %v315_v8 = vsub.s32 0, %v314_v3  ;;  %v319_v9 = vsub.s32 4, %v314_v3  ;;  %v1234_v57 = vld [vmem:[%s1633_s4 + $0x20] sm:$0xff]   ;;  %v1238_v61 = vld [vmem:[%s1633_s4 + $0x10] sm:$0xff]  }
  0x11   : > { %v408_v11 = vsub.s32 3, %v314_v3  ;;  %v412_v12 = vsub.s32 7, %v314_v3  ;;  %v377_v13 = vsub.s32 2, %v314_v3  ;;  %v381_v14 = vsub.s32 6, %v314_v3  ;;  %v1239_v62 = vld [vmem:[%s1633_s4 + $0x48] sm:$0xff]   ;;  %v1242_v2 = vld [vmem:[%s1633_s4] sm:$0xff]  }
  0x12   : > { %v347_v16 = vrot.slane %v311_v1, %v346_v6  ;;  %v351_v17 = vrot.slane %v311_v1, %v350_v7  ;;  %v316_v18 = vrot.slane %v311_v1, %v315_v8  ;;  %v320_v19 = vrot.slane %v311_v1, %v319_v9  ;;  %1150 = vmatpush3.bf16.msra.mxu0 %v1230_v10  ;;  %v1240_v63 = vld [vmem:[%s1633_s4 + $0x8] sm:$0xff]  }
  0x13   : > { %v306_v20 = vunpack.c.l.bf16 %v305_v15  ;;  %v307_v21 = vunpack.c.h.bf16 %v305_v15  ;;  %v409_v22 = vrot.slane %v311_v1, %v408_v11  ;;  %v413_v23 = vrot.slane %v311_v1, %v412_v12  ;;  %1151 = vmatprep.subr.bf16.mxu0 %v1231_v54  ;;  %v1249_v54 = vld [vmem:[%s1632_s3 + $0x60] sm:$0xff]  }
  0x14   : > { %v1406_v24 = vrot.slane %v347_v16, %v346_v6  ;;  %v1408_v25 = vrot.slane %v351_v17, %v346_v6  ;;  %v1410_v26 = vrot.slane %v316_v18, %v315_v8  ;;  %v1412_v27 = vrot.slane %v320_v19, %v315_v8 }
  0x15   : > { %v1414_v28 = vrot.slane %v409_v22, %v408_v11  ;;  %v1416_v29 = vrot.slane %v413_v23, %v408_v11  ;;  %v378_v30 = vrot.slane %v311_v1, %v377_v13  ;;  %v382_v31 = vrot.slane %v311_v1, %v381_v14  ;;  %v1241_v1 = vld [vmem:[%s1633_s4 + $0x40] sm:$0xff]  }
  0x16   : > { %v1419_v32 = vmul.f32 %v1406_v24, %v306_v20  ;;  %v1422_v33 = vmul.f32 %v1408_v25, %v307_v21  ;;  %v1425_v34 = vmul.f32 %v1410_v26, %v306_v20  ;;  %v1428_v35 = vmul.f32 %v1412_v27, %v307_v21  ;;  %1152 = vmatpush3.bf16.msra.mxu0 %v1232_v55  ;;  %v1250_v55 = vld [vmem:[%s1632_s3 + $0x20] sm:$0xff]  }
  0x17   : > { %v1431_v36 = vmul.f32 %v1414_v28, %v306_v20  ;;  %v425_v37 = vmul.f32 %v1416_v29, %v307_v21  ;;  %v1434_v38 = vrot.slane %v378_v30, %v377_v13  ;;  %v1436_v39 = vrot.slane %v382_v31, %v377_v13  ;;  %1153 = vmatprep.subr.bf16.mxu0 %v1233_v56  ;;  %v1251_v56 = vld [vmem:[%s1632_s3 + $0x58] sm:$0xff]  }
  0x18   : > { %v364_v40 = vmul.f32 %v1419_v32, %v1419_v32  ;;  %v365_v41 = vmul.f32 %v1422_v33, %v1422_v33  ;;  %v333_v42 = vmul.f32 %v1425_v34, %v1425_v34  ;;  %v334_v43 = vmul.f32 %v1428_v35, %v1428_v35 }
  0x19   : > { %v426_v44 = vmul.f32 %v1431_v36, %v1431_v36  ;;  %v427_v45 = vmul.f32 %v425_v37, %v425_v37  ;;  %v1449_v46 = vmul.f32 %v1434_v38, %v306_v20  ;;  %v394_v47 = vmul.f32 %v1436_v39, %v307_v21 }
  0x1a   : > { %v366_v48 = vadd.f32 %v365_v41, %v364_v40  ;;  %v335_v52 = vadd.f32 %v334_v43, %v333_v42  ;;  %1154 = vmatpush3.bf16.msra.mxu0 %v1234_v57  ;;  %v1252_v57 = vld [vmem:[%s1632_s3 + $0x18] sm:$0xff]  }
  0x1b   : > { %v428_v49 = vadd.f32 %v427_v45, %v426_v44  ;;  %v395_v50 = vmul.f32 %v1449_v46, %v1449_v46  ;;  %v396_v51 = vmul.f32 %v394_v47, %v394_v47  ;;  %1155 = vmatprep.subr.bf16.mxu0 %v1235_v58 }
  0x1c   : > { %367 = vadd.xlane.f32.xlu0 %v366_v48  ;;  %v1329_v48 = vmov 0  }
  0x1d   : > { %429 = vadd.xlane.f32.xlu1 %v428_v49  ;;  %v397_v53 = vadd.f32 %v396_v51, %v395_v50  ;;  %1226 = vset.pattern.permute.xlu0 %v1329_v48  ;;  %v1243_v49 = vld [vmem:[%s1632_s3 + $0x78] sm:$0xff]   ;;  %v1246_v51 = vld [vmem:[%s1632_s3 + $0x30] sm:$0xff]  }
  0x1e   : > { %1156 = vmatpush3.bf16.msra.mxu0 %v1236_v59  ;;  %1225 = vset.pattern.permute.xlu1 %v1329_v48  ;;  %v1244_v50 = vld [vmem:[%s1632_s3 + $0x38] sm:$0xff]   ;;  %v1531_v59 = vand.u32 127, %v313_v0  ;;  %v1256_v48 = vld [vmem:[%s1632_s3 + $0x8] sm:$0xff]  }
  0x1f   : > { %1157 = vmatprep.subr.bf16.mxu0 %v1237_v60  ;;  %1175 = vmatprep.subr.bf16.mxu1 %v1243_v49  ;;  %v1107_v60 = vld [vmem:[%s1634_s5] ss:$0 sm:$0xff] }
  0x20   : > { %336 = vadd.xlane.f32.xlu0 %v335_v52  ;;  %1176 = vmatpush3.bf16.xpose.msra.mxu1 %v1244_v50  ;;  %v1247_v52 = vld [vmem:[%s1632_s3 + $0x68] sm:$0xff]   ;;  %vm648_vm1 = vcmp.lt.s32.totalorder %v1531_v59, 64  ;;  %vm649_vm2 = vcmp.ge.s32.totalorder %v1531_v59, 64  ;;  %vm998_vm3 = vcmp.eq.s32.totalorder %v1531_v59, 1  ;;  %vm994_vm4 = vcmp.eq.s32.totalorder %v1531_v59, 0 }
  0x21   : > { %398 = vadd.xlane.f32.xlu1 %v397_v53  ;;  %v1248_v53 = vld [vmem:[%s1632_s3 + $0x28] sm:$0xff]  }
  0x22   : > { %1158 = vmatpush3.bf16.msra.mxu0 %v1238_v61 }
  0x23   : > { %1159 = vmatprep.subr.bf16.mxu0 %v1239_v62 }
  0x26   : > { %1160 = vmatpush3.bf16.msra.mxu0 %v1240_v63 }
  0x27   : > { %1161 = vmatprep.subr.bf16.mxu0 %v1241_v1 }
  0x2a   : > { %1162 = vmatpush3.bf16.msra.mxu0 %v1242_v2 }
  0xa5   : > { %v368_v3 = vpop.xlane.xlu0 %367 }
  0xa6   : > { %v369_v4 = vadd.f32 1e-12, %v368_v3  ;;  %v430_v5 = vpop.xlane.xlu1 %429 }
  0xa7   : > { %v431_v6 = vadd.f32 1e-12, %v430_v5 }
  0xa8   : > { %1259 = vrsqrt.f32 %v369_v4 }
  0xa9   : > { %v337_v7 = vpop.xlane.xlu0 %336  ;;  %1261 = vrsqrt.f32 %v431_v6 }
  0xaa   : > { %v338_v8 = vadd.f32 1e-12, %v337_v7  ;;  %v399_v9 = vpop.xlane.xlu1 %398 }
  0xab   : > { %v400_v10 = vadd.f32 1e-12, %v399_v9 }
  0xac   : > { %1263 = vrsqrt.f32 %v338_v8 }
  0xad   : > { %1265 = vrsqrt.f32 %v400_v10 }
  0xb5   : > { %v1260_v11 = vpop.eup %1259 }
  0xb6   : > { %v1262_v12 = vpop.eup %1261  ;;  %v372_v13 = vmul.f32 %v1260_v11, %v1422_v33  ;;  %v371_v14 = vmul.f32 %v1260_v11, %v1419_v32 }
  0xb7   : > { %v434_v15 = vmul.f32 %v1262_v12, %v425_v37  ;;  %v433_v31 = vmul.f32 %v1262_v12, %v1431_v36 }
  0xb8   : > { %v374_v16 = vpack.c.bf16 %v372_v13, %v372_v13  ;;  %v373_v17 = vpack.c.bf16 %v371_v14, %v371_v14 }
  0xb9   : > { %v1264_v18 = vpop.eup %1263  ;;  %v436_v19 = vpack.c.bf16 %v434_v15, %v434_v15 }
  0xba   : > { %v1266_v20 = vpop.eup %1265  ;;  %v341_v21 = vmul.f32 %v1264_v18, %v1428_v35  ;;  %v340_v22 = vmul.f32 %v1264_v18, %v1425_v34  ;;  %v440_v41 = vrot.slane %v374_v16, 4  ;;  %v439_v42 = vrot.slane %v373_v17, 4 }
  0xbb   : > { %v403_v23 = vmul.f32 %v1266_v20, %v394_v47  ;;  %v444_v30 = vrot.slane %v436_v19, 4  ;;  %v402_v35 = vmul.f32 %v1266_v20, %v1449_v46  ;;  %v435_v34 = vpack.c.bf16 %v433_v31, %v433_v31  ;;  %v1245_v46 = vld [vmem:[%s1632_s3 + $0x70] sm:$0xff]  }
  0xbc   : > { %v343_v40 = vpack.c.bf16 %v341_v21, %v341_v21  ;;  %v342_v33 = vpack.c.bf16 %v340_v22, %v340_v22  ;;  %1177 = vmatprep.subr.bf16.mxu1 %v1245_v46 }
  0xbd   : > { %v405_v32 = vpack.c.bf16 %v403_v23, %v403_v23  ;;  %v404_v45 = vpack.c.bf16 %v402_v35, %v402_v35  ;;  %v443_v47 = vrot.slane %v435_v34, 4  ;;  %1178 = vmatpush3.bf16.xpose.msra.mxu1 %v1246_v51 }
  0xbe   : > { %v452_v37 = vsel %vm445_vm0, %v343_v40, %v440_v41  ;;  %v448_v43 = vsel %vm445_vm0, %v342_v33, %v439_v42  ;;  %1179 = vmatprep.subr.bf16.mxu1 %v1247_v52  ;;  %v1254_v40 = vld [vmem:[%s1632_s3 + $0x10] sm:$0xff]  }
  0xbf   : > { %629 = vmatprep.mubr.bf16.mxu0 %v452_v37  ;;  %v460_v44 = vsel %vm445_vm0, %v405_v32, %v444_v30  ;;  %v456_v36 = vsel %vm445_vm0, %v404_v45, %v443_v47  ;;  %v1253_v30 = vld [vmem:[%s1632_s3 + $0x50] sm:$0xff]   ;;  %v1255_v45 = vld [vmem:[%s1632_s3 + $0x48] sm:$0xff]  }
  0xc0   : > { %630 = vmatmul.mubr.bf16.vlgmr.msra.gmra.mxu0 %v448_v43 }
  0xc1   : > { %637 = vmatprep.mubr.bf16.mxu0 %v460_v44 }
  0xc5   : > { %1180 = vmatpush3.bf16.xpose.msra.mxu1 %v1248_v53 }
  0xc6   : > { %1181 = vmatprep.subr.bf16.mxu1 %v1249_v54 }
  0xc8   : > { %638 = vmatmul.mubr.bf16.gmra.mxu0 %v456_v36 }
  0xcd   : > { %1182 = vmatpush3.bf16.xpose.msra.mxu1 %v1250_v55 }
  0xce   : > { %1183 = vmatprep.subr.bf16.mxu1 %v1251_v56 }
  0xd5   : > { %1184 = vmatpush3.bf16.xpose.msra.mxu1 %v1252_v57 }
  0xd6   : > { %1185 = vmatprep.subr.bf16.mxu1 %v1253_v30 }
  0xdd   : > { %1186 = vmatpush3.bf16.xpose.msra.mxu1 %v1254_v40 }
  0xde   : > { %1187 = vmatprep.subr.bf16.mxu1 %v1255_v45 }
  0xe5   : > { %1188 = vmatpush3.bf16.xpose.msra.mxu1 %v1256_v48 }
 0x180   : > { %v1163_v58 = vpop.f32.mrf.mxu0 }
 0x182   : > { %v1164_v61 = vpop.f32.mrf.mxu0 }
 0x183   : > { %v1165_v62 = vadd.f32 %v1164_v61, %v1163_v58 }
 0x184   : > { %v1166_v63 = vpop.f32.mrf.mxu0 }
 0x185   : > { %v632_v1 = vadd.f32 %v1165_v62, %v1107_v60 }
 0x186   : > { %v1167_v2 = vpop.f32.mrf.mxu0 }
 0x187   : > { %v672_v3 = vmul.f32 1.442695, %v632_v1  ;;  %v1168_v4 = vadd.f32 %v1167_v2, %v1166_v63  ;;  %v1539_v5 = vsel %vm648_vm1, %v632_v1, 0.0  ;;  %v660_v21 = vmul.f32 %v632_v1, %v632_v1  ;;  %v1257_v2 = vld [vmem:[%s1632_s3 + $0x40] sm:$0xff]  }
 0x188   : > { %v1169_v6 = vpop.f32.mrf.mxu0  ;;  %v721_v0 = vmul.f32 %v1539_v5, %v1539_v5  ;;  %1189 = vmatprep.subr.bf16.mxu1 %v1257_v2 }
 0x189   : > { %1267 = vpow2.f32 %v672_v3  ;;  %v635_v7 = vadd.f32 %v1168_v4, %v1107_v60  ;;  %v1124_v42 = vadd.f32 -1.0, %v660_v21  ;;  %v1258_v3 = vld [vmem:[%s1632_s3] sm:$0xff]  }
 0x18a   : > { %v1170_v8 = vpop.f32.mrf.mxu0  ;;  %725 = vadd.xlane.f32.xlu0 %v721_v0  ;;  %v1330_v0 = vmov 1.0   ;;  %1190 = vmatpush3.bf16.xpose.msra.mxu1 %v1258_v3 }
 0x18b   : > { %v674_v9 = vmul.f32 1.442695, %v635_v7  ;;  %v1171_v10 = vadd.f32 %v1170_v8, %v1169_v6  ;;  %v1545_v11 = vsel %vm648_vm1, %v635_v7, 0.0  ;;  %v661_v33 = vmul.f32 %v635_v7, %v635_v7 }
 0x18c   : > { %v1172_v12 = vpop.f32.mrf.mxu0  ;;  %v722_v13 = vmul.f32 %v1545_v11, %v1545_v11  ;;  %v668_v34 = vmul.f32 0.5, %v1124_v42 }
 0x18d   : > { %1269 = vpow2.f32 %v674_v9  ;;  %v640_v14 = vadd.f32 %v1171_v10, %v1107_v60  ;;  %v1125_v35 = vadd.f32 -1.0, %v661_v33 }
 0x18e   : > { %v1173_v15 = vpop.f32.mrf.mxu0  ;;  %727 = vadd.xlane.f32.xlu1 %v722_v13 }
 0x18f   : > { %v676_v16 = vmul.f32 1.442695, %v640_v14  ;;  %v1174_v17 = vadd.f32 %v1173_v15, %v1172_v12  ;;  %v1551_v18 = vsel %vm648_vm1, %v640_v14, 0.0  ;;  %v662_v44 = vmul.f32 %v640_v14, %v640_v14 }
 0x190   : > { %v723_v19 = vmul.f32 %v1551_v18, %v1551_v18  ;;  %v669_v52 = vmul.f32 0.5, %v1125_v35 }
 0x191   : > { %1271 = vpow2.f32 %v676_v16  ;;  %v643_v20 = vadd.f32 %v1174_v17, %v1107_v60  ;;  %v1126_v51 = vadd.f32 -1.0, %v662_v44 }
 0x192   : > { %729 = vadd.xlane.f32.xlu0 %v723_v19 }
 0x193   : > { %v678_v22 = vmul.f32 1.442695, %v643_v20  ;;  %v1557_v23 = vsel %vm648_vm1, %v643_v20, 0.0  ;;  %v663_v53 = vmul.f32 %v643_v20, %v643_v20  ;;  %v670_v60 = vmul.f32 0.5, %v1126_v51 }
 0x194   : > { %v724_v31 = vmul.f32 %v1557_v23, %v1557_v23 }
 0x195   : > { %1273 = vpow2.f32 %v678_v22  ;;  %v1127_v61 = vadd.f32 -1.0, %v663_v53 }
 0x196   : > { %v1268_v41 = vpop.eup %1267  ;;  %731 = vadd.xlane.f32.xlu1 %v724_v31 }
 0x197   : > { %v680_v32 = vsub.f32 %v1268_v41, %v632_v1  ;;  %v671_v6 = vmul.f32 0.5, %v1127_v61 }
 0x199   : > { %v684_v37 = vmul.f32 0.5, %v680_v32 }
 0x19a   : > { %v1270_v43 = vpop.eup %1269 }
 0x19b   : > { %v681_v47 = vsub.f32 %v1270_v43, %v635_v7  ;;  %v688_v36 = vsel %vm649_vm2, %v684_v37, 0.0 }
 0x19c   : > { %v692_v49 = vsel %vm648_vm1, %v668_v34, %v688_v36 }
 0x19d   : > { %v685_v50 = vmul.f32 0.5, %v681_v47 }
 0x19e   : > { %v1272_v46 = vpop.eup %1271 }
 0x19f   : > { %v682_v54 = vsub.f32 %v1272_v46, %v640_v14  ;;  %v689_v55 = vsel %vm649_vm2, %v685_v50, 0.0 }
 0x1a0   : > { %v693_v56 = vsel %vm648_vm1, %v669_v52, %v689_v55 }
 0x1a1   : > { %v686_v57 = vmul.f32 0.5, %v682_v54 }
 0x1a2   : > { %v1274_v58 = vpop.eup %1273 }
 0x1a3   : > { %v690_v62 = vsel %vm649_vm2, %v686_v57, 0.0  ;;  %v683_v63 = vsub.f32 %v1274_v58, %v643_v20 }
 0x1a4   : > { %v694_v1 = vsel %vm648_vm1, %v670_v60, %v690_v62 }
 0x1a5   : > { %v687_v4 = vmul.f32 0.5, %v683_v63 }
 0x1a7   : > { %698 = vperm.xlu1 %1225, %v1330_v0   ;;  %v691_v7 = vsel %vm649_vm2, %v687_v4, 0.0 }
 0x1a8   : > { %v695_v8 = vsel %vm648_vm1, %v671_v6, %v691_v7 }
 0x213   : > { %v726_v9 = vpop.xlane.xlu0 %725 }
 0x214   : > { %v733_v10 = vadd.f32 1e-12, %v726_v9 }
 0x216   : > { %1275 = vrsqrt.f32 %v733_v10 }
 0x217   : > { %v728_v12 = vpop.xlane.xlu1 %727 }
 0x218   : > { %v734_v13 = vadd.f32 1e-12, %v728_v12 }
 0x21a   : > { %1277 = vrsqrt.f32 %v734_v13 }
 0x21b   : > { %v730_v14 = vpop.xlane.xlu0 %729 }
 0x21c   : > { %v735_v15 = vadd.f32 1e-12, %v730_v14 }
 0x21e   : > { %1279 = vrsqrt.f32 %v735_v15 }
 0x21f   : > { %v732_v16 = vpop.xlane.xlu1 %731 }
 0x220   : > { %v736_v17 = vadd.f32 1e-12, %v732_v16 }
 0x222   : > { %1281 = vrsqrt.f32 %v736_v17 }
 0x223   : > { %v699_v19 = vpop.permute.xlu1 %698  ;;  %v1276_v22 = vpop.eup %1275 }
 0x224   : > { %v701_v20 = vmul.f32 %v699_v19, %v692_v49  ;;  %v702_v21 = vmul.f32 %v699_v19, %v693_v56  ;;  %v703_v30 = vmul.f32 %v699_v19, %v694_v1  ;;  %v741_v41 = vmul.f32 %v1276_v22, %v1539_v5 }
 0x225   : > { %v704_v42 = vmul.f32 %v699_v19, %v695_v8 }
 0x226   : > { %v705_v31 = vadd.f32 %v702_v21, %v701_v20 }
 0x227   : > { %v1278_v40 = vpop.eup %1277 }
 0x228   : > { %v742_v33 = vmul.f32 %v1278_v40, %v1545_v11  ;;  %v706_v32 = vadd.f32 %v705_v31, %v703_v30 }
 0x22a   : > { %v745_v37 = vpack.c.bf16 %v742_v33, %v741_v41  ;;  %v1598_v43 = vadd.f32 %v706_v32, %v704_v42 }
 0x22b   : > { %v1280_v44 = vpop.eup %1279 }
 0x22c   : > { %1191 = vmatprep.mubr.bf16.mxu1 %v745_v37  ;;  %v743_v34 = vmul.f32 %v1280_v44, %v1551_v18 }
 0x22d   : > { %1192 = vmatmul.mubr.bf16.vlgmr.msra.gmra.mxu1 %v745_v37 }
 0x22f   : > { %v1282_v35 = vpop.eup %1281 }
 0x230   : > { %v744_v45 = vmul.f32 %v1282_v35, %v1557_v23 }
 0x232   : > { %v746_v47 = vpack.c.bf16 %v744_v45, %v743_v34  ;;  %v308_v34 = vld [vmem:[%s1630_s1] sm:$0xff] }
 0x234   : > { %1193 = vmatprep.mubr.bf16.mxu1 %v746_v47 }
 0x235   : > { %1194 = vmatmul.mubr.bf16.gmra.mxu1 %v746_v47 }
 0x2ed   : > { %v909_v36 = vpop.f32.mrf.mxu1 }
 0x2ee   : > { %v928_v5 = vmul.f32 10.0, %v909_v36 }
 0x2ef   : > { %v911_v48 = vpop.f32.mrf.mxu1 }
 0x2f0   : > { %v929_v11 = vmul.f32 10.0, %v911_v48  ;;  %v936_v50 = vmul.f32 1.442695, %v928_v5  ;;  %v309_v5 = vunpack.c.l.bf16 %v308_v34  ;;  %v310_v48 = vunpack.c.h.bf16 %v308_v34 }
 0x2f1   : > { %v913_v49 = vpop.f32.mrf.mxu1 }
 0x2f2   : > { %v930_v46 = vmul.f32 10.0, %v913_v49  ;;  %v938_v54 = vmul.f32 1.442695, %v929_v11  ;;  %1283 = vpow2.f32 %v936_v50 }
 0x2f3   : > { %v915_v51 = vpop.f32.mrf.mxu1 }
 0x2f4   : > { %v940_v52 = vmul.f32 1.442695, %v930_v46  ;;  %v931_v53 = vmul.f32 10.0, %v915_v51 }
 0x2f5   : > { %v919_v55 = vpop.f32.mrf.mxu1 }
 0x2f6   : > { %v942_v56 = vmul.f32 1.442695, %v931_v53  ;;  %v932_v18 = vmul.f32 10.0, %v919_v55  ;;  %1285 = vpow2.f32 %v940_v52 }
 0x2f7   : > { %v921_v23 = vpop.f32.mrf.mxu1 }
 0x2f8   : > { %1287 = vpow2.f32 %v942_v56  ;;  %v944_v57 = vmul.f32 1.442695, %v932_v18  ;;  %v933_v58 = vmul.f32 10.0, %v921_v23 }
 0x2f9   : > { %1289 = vpow2.f32 %v938_v54  ;;  %v923_v60 = vpop.f32.mrf.mxu1 }
 0x2fa   : > { %1291 = vpow2.f32 %v944_v57  ;;  %v946_v61 = vmul.f32 1.442695, %v933_v58  ;;  %v934_v62 = vmul.f32 10.0, %v923_v60 }
 0x2fb   : > { %v925_v63 = vpop.f32.mrf.mxu1 }
 0x2fc   : > { %1293 = vpow2.f32 %v946_v61  ;;  %v948_v1 = vmul.f32 1.442695, %v934_v62  ;;  %v935_v2 = vmul.f32 10.0, %v925_v63 }
 0x2fe   : > { %1295 = vpow2.f32 %v948_v1  ;;  %v950_v3 = vmul.f32 1.442695, %v935_v2 }
 0x2ff   : > { %v1284_v4 = vpop.eup %1283 }
 0x300   : > { %1297 = vpow2.f32 %v950_v3  ;;  %v952_v13 = vmul.f32 %v1284_v4, %v1410_v26 }
 0x303   : > { %v1286_v6 = vpop.eup %1285 }
 0x304   : > { %v956_v9 = vmul.f32 %v1286_v6, %v1406_v24 }
 0x305   : > { %v1288_v0 = vpop.eup %1287 }
 0x306   : > { %v1290_v7 = vpop.eup %1289  ;;  %v957_v10 = vmul.f32 %v1288_v0, %v1408_v25  ;;  %v958_v19 = vadd.f32 %v956_v9, %v952_v13 }
 0x307   : > { %v1292_v8 = vpop.eup %1291  ;;  %v953_v14 = vmul.f32 %v1290_v7, %v1412_v27 }
 0x308   : > { %v960_v15 = vmul.f32 %v1292_v8, %v1434_v38 }
 0x309   : > { %v1294_v12 = vpop.eup %1293  ;;  %v959_v20 = vadd.f32 %v957_v10, %v953_v14 }
 0x30a   : > { %v961_v16 = vmul.f32 %v1294_v12, %v1436_v39  ;;  %v962_v30 = vadd.f32 %v960_v15, %v958_v19 }
 0x30b   : > { %v1296_v17 = vpop.eup %1295 }
 0x30c   : > { %v964_v21 = vmul.f32 %v1296_v17, %v1414_v28  ;;  %v963_v31 = vadd.f32 %v961_v16, %v959_v20 }
 0x30d   : > { %v1298_v22 = vpop.eup %1297 }
 0x30e   : > { %v965_v24 = vmul.f32 %v1298_v22, %v1416_v29  ;;  %v966_v25 = vadd.f32 %v964_v21, %v962_v30 }
 0x310   : > { %v967_v40 = vadd.f32 %v965_v24, %v963_v31  ;;  %v968_v26 = vadd.f32 1e-12, %v966_v25 }
 0x312   : > { %v974_v41 = vadd.f32 %v967_v40, %v966_v25  ;;  %v969_v27 = vadd.f32 1e-12, %v967_v40  ;;  %1299 = vlog2.f32 %v968_v26 }
 0x314   : > { %975 = vadd.xlane.f32.xlu0 %v974_v41  ;;  %1301 = vlog2.f32 %v969_v27 }
 0x318   : > { %708 = vadd.xlane.f32.xlu0 %v1598_v43 }
 0x31f   : > { %v1300_v44 = vpop.eup %1299 }
 0x320   : > { %v971_v47 = vmul.f32 0.6931472, %v1300_v44 }
 0x321   : > { %v1302_v35 = vpop.eup %1301 }
 0x322   : > { %v973_v11 = vmul.f32 0.6931472, %v1302_v35 }
 0x39d   : > { %v976_v38 = vpop.xlane.xlu0 %975 }
 0x39e   : > { %v977_v39 = vadd.f32 1e-12, %v976_v38 }
 0x3a0   : > { %1303 = vlog2.f32 %v977_v39 }
 0x3a1   : > { %v709_v33 = vpop.xlane.xlu0 %708 }
 0x3a2   : > { %v710_v28 = vrot.slane %v709_v33, 4 }
 0x3a4   : > { %v711_v42 = vadd.f32 %v710_v28, %v709_v33 }
 0x3a6   : > { %v712_v32 = vrot.slane %v711_v42, 2 }
 0x3a8   : > { %v713_v37 = vadd.f32 %v712_v32, %v711_v42 }
 0x3aa   : > { %v714_v29 = vrot.slane %v713_v37, 1 }
 0x3ac   : > { %v715_v43 = vadd.f32 %v714_v29, %v713_v37 }
 0x3ad   : > { %v1304_v45 = vpop.eup %1303 }
 0x3ae   : > { %v979_v36 = vmul.f32 0.6931472, %v1304_v45  ;;  %1195 = vpush %v715_v43 }
 0x3b0   : > { %v980_v49 = vsub.f32 %v979_v36, %v971_v47  ;;  %v981_v50 = vsub.f32 %v979_v36, %v973_v11 }
 0x3b2   : > { %v982_v46 = vmul.f32 %v980_v49, %v309_v5  ;;  %v983_v51 = vmul.f32 %v981_v50, %v310_v48 }
 0x3b4   : > { %v984_v52 = vadd.f32 %v983_v51, %v982_v46 }
 0x3b6   : > { %985 = vadd.xlane.f32.xlu0 %v984_v52 }
 0x3df   : > { %s1196_s15 = spop %1195 }
 0x3e0   : > { %v999_v58 = vstv %s1196_s15 }
 0x3e1   : > { %v1000_v61 = vsel %vm998_vm3, %v999_v58, 0.0 }
 0x43f   : > { %v986_v53 = vpop.xlane.xlu0 %985 }
 0x440   : > { %v987_v54 = vrot.slane %v986_v53, 4 }
 0x442   : > { %v988_v55 = vadd.f32 %v987_v54, %v986_v53 }
 0x444   : > { %v989_v56 = vrot.slane %v988_v55, 2 }
 0x446   : > { %v990_v18 = vadd.f32 %v989_v56, %v988_v55 }
 0x448   : > { %v991_v23 = vrot.slane %v990_v18, 1 }
 0x44a   : > { %v992_v57 = vadd.f32 %v991_v23, %v990_v18 }
 0x44c   : > { %1197 = vpush %v992_v57 }
 0x47d   : > { %s1198_s16 = spop %1197 }
 0x47e   : > { %v995_v60 = vstv %s1198_s16 }
 0x47f   : > { %v996_v62 = vsel %vm994_vm4, %v995_v60, 0.0 }
 0x480   : > { %v1001_v63 = vadd.f32 %v1000_v61, %v996_v62 }
 0x482   : > { %1002 = vst [vmem:[%s303_s19] sm:$0x1] %v1001_v63 }
 0x483 PF: > { %s16_s23 = sadd.s32 1, %s1327_s23   ;;  %s1636_s21 = smov %s1323_s22 }
 0x484   : > { %p13_p5 = scmp.ge.s32.totalorder %s16_s23, 4   ;;  %s1637_s22 = smov %s1639_s24 }
 0x486   :  { %15 = sbr.rel (!%p13_p5) target bundleno = 2 (0x2), region = 77 }

</bundles_post_ra>
